<compile_context>
chip_gen: v6e
topology: v6e:2x2x1
jax: 0.10.0
libtpu: 0.0.40
codegen_flags: <defaults>
</compile_context>

<pallas_src>
import functools

import jax
import jax.numpy as jnp
from jax.experimental import pallas as pl
from jax.experimental.pallas import tpu as pltpu


def _round_up(x, m):
    return ((x + m - 1) // m) * m


def _make_conv_kernel(*, n_off_h, n_off_w, oh, ow, wq, n_out, n_pad, out_dtype):
    """Builds the per-image fused im2col + matmul kernel.

    Refs:
      x_ref  : (1, Hq*Wq, Cp)   bf16   space-to-depth input, one image
      w_ref  : (n_off, Cp, Npad) bf16  per-offset weight (resident)
      b_ref  : (1, N)           f32    bias
      o_ref  : (1, N, OH*OW)    f32    channels-major output (NCHW-ready)
      acc_ref: (OH*OW, Npad)    f32    VMEM accumulator scratch
    """

    def kernel(x_ref, w_ref, b_ref, o_ref, acc_ref):
        acc_ref[...] = jnp.zeros_like(acc_ref)
        # TODO(synk): for very large OH (dense-conv regime) switch the static
        # unroll below to lax.fori_loop / an extra grid axis; for the patch
        # embedding shapes targeted here the unroll count is tiny.
        for ip in range(n_off_h):
            for jp in range(n_off_w):
                w_off = w_ref[ip * n_off_w + jp]                 # (Cp, Npad)
                for r in range(oh):
                    start = (r + ip) * wq + jp                   # static int
                    rows = x_ref[0, start:start + ow, :]         # (OW, Cp)
                    acc_ref[r * ow:(r + 1) * ow, :] += jnp.dot(
                        rows, w_off, preferred_element_type=jnp.float32)
        out = acc_ref[:, :n_out] + b_ref[...]                    # (M_b, N) f32
        # Transposed store -> HBM output is already channels-major (NCHW after
        # a free reshape); XLU handles the transpose, HBM sees no extra pass.
        o_ref[0] = out.T.astype(out_dtype)

    return kernel


@functools.partial(jax.jit, static_argnames=("stride", "padding"))
def conv_embedding_forward(x, weight, bias, *, stride, padding):
    """x: (B, C, H, W) NCHW;  weight: (OUT, C, KH, KW);  bias: (OUT,). NCHW out."""
    b, c, h, w = x.shape
    out_ch, _, kh, kw = weight.shape
    s, p = stride, padding
    compute_dtype = jnp.bfloat16

    oh = (h + 2 * p - kh) // s + 1
    ow = (w + 2 * p - kw) // s + 1

    # Zero-pad the kernel spatially to a multiple of the stride: the conv then
    # becomes a stride-1 conv with a (kh2/s x kw2/s) kernel over a
    # space-to-depth input with Cp = s*s*C channels.
    kh2, kw2 = _round_up(kh, s), _round_up(kw, s)
    n_off_h, n_off_w = kh2 // s, kw2 // s
    n_off = n_off_h * n_off_w

    hp = _round_up(max((oh - 1) * s + kh2, h + 2 * p), s)
    wp = _round_up(max((ow - 1) * s + kw2, w + 2 * p), s)
    hq, wq = hp // s, wp // s
    cp = s * s * c

    # ---- input: NCHW f32 -> padded NHWC bf16 -> space-to-depth (B, Hq*Wq, Cp)
    # Single fused XLA pass over the (small) input; no patch-matrix blow-up.
    x_nhwc = x.astype(compute_dtype).transpose(0, 2, 3, 1)
    x_pad = jnp.pad(x_nhwc, ((0, 0), (p, hp - h - p), (p, wp - w - p), (0, 0)))
    x_s2d = (x_pad.reshape(b, hq, s, wq, s, c)
                  .transpose(0, 1, 3, 2, 4, 5)
                  .reshape(b, hq * wq, cp))

    # ---- weight: (OUT, C, kh, kw) -> zero-pad -> (n_off, Cp, Npad) bf16
    w_pad = jnp.pad(weight, ((0, 0), (0, 0), (0, kh2 - kh), (0, kw2 - kw)))
    w_r = (w_pad.transpose(2, 3, 1, 0)                     # (kh2, kw2, C, OUT)
                .reshape(n_off_h, s, n_off_w, s, c, out_ch)
                .transpose(0, 2, 1, 3, 4, 5)               # (ih, iw, s, s, C, OUT)
                .reshape(n_off, cp, out_ch)
                .astype(compute_dtype))
    n_pad = _round_up(out_ch, 128)                          # lane-dense acc/MXU only
    if n_pad != out_ch:
        w_r = jnp.pad(w_r, ((0, 0), (0, 0), (0, n_pad - out_ch)))
    b2d = bias.reshape(1, out_ch).astype(jnp.float32)

    m_b = oh * ow
    kernel = _make_conv_kernel(n_off_h=n_off_h, n_off_w=n_off_w, oh=oh, ow=ow,
                               wq=wq, n_out=out_ch, n_pad=n_pad,
                               out_dtype=x.dtype)

    out_bytes = b * out_ch * m_b * jnp.dtype(x.dtype).itemsize
    cost = pl.CostEstimate(
        flops=2 * b * m_b * n_off * cp * n_pad,
        transcendentals=0,
        bytes_accessed=int(x_s2d.size * 2 + w_r.size * 2 + out_bytes))

    # TODO(synk): for B == 1 add an output-row-block grid axis so both v7x
    # TensorCores stay busy; for B >= 2 the per-image "parallel" grid suffices.
    out = pl.pallas_call(
        kernel,
        out_shape=jax.ShapeDtypeStruct((b, out_ch, m_b), x.dtype),
        grid_spec=pltpu.PrefetchScalarGridSpec(
            num_scalar_prefetch=0,
            grid=(b,),
            in_specs=[
                pl.BlockSpec((1, hq * wq, cp), lambda i: (i, 0, 0)),
                pl.BlockSpec((n_off, cp, n_pad), lambda i: (0, 0, 0)),
                pl.BlockSpec((1, out_ch), lambda i: (0, 0)),
            ],
            out_specs=pl.BlockSpec((1, out_ch, m_b), lambda i: (i, 0, 0)),
            scratch_shapes=[pltpu.VMEM((m_b, n_pad), jnp.float32)],
        ),
        compiler_params=pltpu.CompilerParams(
            dimension_semantics=("parallel",)),
        cost_estimate=cost,
    )(x_s2d, w_r, b2d)

    # (B, OUT, OH*OW) -> (B, OUT, OH, OW): contiguous split, no transpose pass.
    return out.reshape(b, out_ch, oh, ow)


def _reference(x, weight, bias, stride, padding):
    # XLA conv on bf16-rounded inputs (kernel uses bf16 MXU inputs + f32 acc).
    x_r = x.astype(jnp.bfloat16).astype(jnp.float32)
    w_r = weight.astype(jnp.bfloat16).astype(jnp.float32)
    y = jax.lax.conv_general_dilated(
        x_r, w_r, window_strides=(stride, stride),
        padding=((padding, padding), (padding, padding)),
        dimension_numbers=("NCHW", "OIHW", "NCHW"))
    return y + bias.reshape(1, -1, 1, 1)


if __name__ == "__main__":
    # Shapes consistent with conv_embedding(in=4, out=32, patch=4, stride=2, pad=1)
    B, C, H, W = 2, 4, 16, 16
    OUT, KH, KW = 32, 4, 4

    key = jax.random.PRNGKey(0)
    kx, kwt, kb = jax.random.split(key, 3)
    x = jax.random.normal(kx, (B, C, H, W), dtype=jnp.float32)
    fan_in = C * KH * KW
    bound = 1.0 / (fan_in ** 0.5)
    weight = jax.random.uniform(kwt, (OUT, C, KH, KW), jnp.float32, -bound, bound)
    bias = jax.random.uniform(kb, (OUT,), jnp.float32, -bound, bound)

    # Config 1: the module's test config (stride < kernel, overlapping patches).
    out = jax.block_until_ready(
        conv_embedding_forward(x, weight, bias, stride=2, padding=1))
    ref = _reference(x, weight, bias, 2, 1)
    assert out.shape == (B, OUT, 8, 8), out.shape
    assert jnp.allclose(out, ref, atol=5e-3, rtol=5e-3), \
        float(jnp.max(jnp.abs(out - ref)))

    # Config 2: canonical patch embed (stride == kernel) -> single-offset path.
    out2 = jax.block_until_ready(
        conv_embedding_forward(x, weight, bias, stride=4, padding=0))
    ref2 = _reference(x, weight, bias, 4, 0)
    assert out2.shape == (B, OUT, 4, 4), out2.shape
    assert jnp.allclose(out2, ref2, atol=5e-3, rtol=5e-3), \
        float(jnp.max(jnp.abs(out2 - ref2)))

    print("KERNEL_OK")
</pallas_src>

<mosaic_0001>
module attributes {stable_mosaic.version = 11 : i64} {
  func.func @kernel(%arg0: i32, %arg1: memref<1x81x16xbf16, #tpu.memory_space<vmem>>, %arg2: memref<4x16x128xbf16, #tpu.memory_space<vmem>>, %arg3: memref<1x32xf32, #tpu.memory_space<vmem>>, %arg4: memref<1x32x64xf32, #tpu.memory_space<vmem>>, %arg5: memref<64x128xf32, #tpu.memory_space<vmem>>) attributes {dimension_semantics = [#tpu.dimension_semantics<parallel>], iteration_bounds = array<i64: 2>, scalar_prefetch = 0 : i64, scratch_operands = 1 : i64, tpu.core_type = #tpu.core_type<tc>, window_params = [{transform_indices = @transform_0, window_bounds = array<i64: 1, 81, 16>}, {pipeline_mode = #tpu.pipeline_mode<synchronous>, transform_indices = @transform_1, window_bounds = array<i64: 4, 16, 128>}, {pipeline_mode = #tpu.pipeline_mode<synchronous>, transform_indices = @transform_2, window_bounds = array<i64: 1, 32>}, {transform_indices = @transform_3, window_bounds = array<i64: 1, 32, 64>}]} {
    %cst = arith.constant 0.000000e+00 : f32
    %0 = vector.broadcast %cst : f32 to vector<64x128xf32>
    %c0 = arith.constant 0 : index
    %c0_0 = arith.constant 0 : index
    %1 = vector.load %arg5[%c0, %c0_0] : memref<64x128xf32, #tpu.memory_space<vmem>>, vector<64x128xf32>
    tpu.vector_store %arg5[%c0, %c0_0], %0 {strides = array<i32>} : memref<64x128xf32, #tpu.memory_space<vmem>>, vector<64x128xf32>,
    %c0_1 = arith.constant 0 : index
    %c0_2 = arith.constant 0 : index
    %c0_3 = arith.constant 0 : index
    %2 = vector.load %arg2[%c0_1, %c0_2, %c0_3] : memref<4x16x128xbf16, #tpu.memory_space<vmem>>, vector<1x16x128xbf16>
    %3 = vector.shape_cast %2 : vector<1x16x128xbf16> to vector<16x128xbf16>
    %c0_4 = arith.constant 0 : index
    %c0_5 = arith.constant 0 : index
    %c0_6 = arith.constant 0 : index
    %4 = vector.load %arg1[%c0_4, %c0_5, %c0_6] : memref<1x81x16xbf16, #tpu.memory_space<vmem>>, vector<1x8x16xbf16>
    %5 = vector.shape_cast %4 : vector<1x8x16xbf16> to vector<8x16xbf16>
    %c0_7 = arith.constant 0 : index
    %c0_8 = arith.constant 0 : index
    %6 = vector.load %arg5[%c0_7, %c0_8] : memref<64x128xf32, #tpu.memory_space<vmem>>, vector<8x128xf32>
    %cst_9 = arith.constant dense<0.000000e+00> : vector<8x128xf32>
    %7 = tpu.matmul %5, %3, %cst_9 {dimension_numbers = #tpu.dot_dimension_numbers<[1], [0], [0], [1], [0, 0, 1, 1], [], []>} : vector<8x16xbf16>, vector<16x128xbf16>, vector<8x128xf32> -> vector<8x128xf32>
    %8 = arith.addf %6, %7 : vector<8x128xf32>
    %c0_10 = arith.constant 0 : index
    %c0_11 = arith.constant 0 : index
    %9 = vector.load %arg5[%c0_10, %c0_11] : memref<64x128xf32, #tpu.memory_space<vmem>>, vector<8x128xf32>
    tpu.vector_store %arg5[%c0_10, %c0_11], %8 {strides = array<i32>} : memref<64x128xf32, #tpu.memory_space<vmem>>, vector<8x128xf32>,
    %c0_12 = arith.constant 0 : index
    %c9 = arith.constant 9 : index
    %c0_13 = arith.constant 0 : index
    %10 = vector.load %arg1[%c0_12, %c9, %c0_13] : memref<1x81x16xbf16, #tpu.memory_space<vmem>>, vector<1x8x16xbf16>
    %11 = vector.shape_cast %10 : vector<1x8x16xbf16> to vector<8x16xbf16>
    %c8 = arith.constant 8 : index
    %c0_14 = arith.constant 0 : index
    %12 = vector.load %arg5[%c8, %c0_14] : memref<64x128xf32, #tpu.memory_space<vmem>>, vector<8x128xf32>
    %cst_15 = arith.constant dense<0.000000e+00> : vector<8x128xf32>
    %13 = tpu.matmul %11, %3, %cst_15 {dimension_numbers = #tpu.dot_dimension_numbers<[1], [0], [0], [1], [0, 0, 1, 1], [], []>} : vector<8x16xbf16>, vector<16x128xbf16>, vector<8x128xf32> -> vector<8x128xf32>
    %14 = arith.addf %12, %13 : vector<8x128xf32>
    %c8_16 = arith.constant 8 : index
    %c0_17 = arith.constant 0 : index
    %15 = vector.load %arg5[%c8_16, %c0_17] : memref<64x128xf32, #tpu.memory_space<vmem>>, vector<8x128xf32>
    tpu.vector_store %arg5[%c8_16, %c0_17], %14 {strides = array<i32>} : memref<64x128xf32, #tpu.memory_space<vmem>>, vector<8x128xf32>,
    %c0_18 = arith.constant 0 : index
    %c18 = arith.constant 18 : index
    %c0_19 = arith.constant 0 : index
    %16 = vector.load %arg1[%c0_18, %c18, %c0_19] : memref<1x81x16xbf16, #tpu.memory_space<vmem>>, vector<1x8x16xbf16>
    %17 = vector.shape_cast %16 : vector<1x8x16xbf16> to vector<8x16xbf16>
    %c16 = arith.constant 16 : index
    %c0_20 = arith.constant 0 : index
    %18 = vector.load %arg5[%c16, %c0_20] : memref<64x128xf32, #tpu.memory_space<vmem>>, vector<8x128xf32>
    %cst_21 = arith.constant dense<0.000000e+00> : vector<8x128xf32>
    %19 = tpu.matmul %17, %3, %cst_21 {dimension_numbers = #tpu.dot_dimension_numbers<[1], [0], [0], [1], [0, 0, 1, 1], [], []>} : vector<8x16xbf16>, vector<16x128xbf16>, vector<8x128xf32> -> vector<8x128xf32>
    %20 = arith.addf %18, %19 : vector<8x128xf32>
    %c16_22 = arith.constant 16 : index
    %c0_23 = arith.constant 0 : index
    %21 = vector.load %arg5[%c16_22, %c0_23] : memref<64x128xf32, #tpu.memory_space<vmem>>, vector<8x128xf32>
    tpu.vector_store %arg5[%c16_22, %c0_23], %20 {strides = array<i32>} : memref<64x128xf32, #tpu.memory_space<vmem>>, vector<8x128xf32>,
    %c0_24 = arith.constant 0 : index
    %c27 = arith.constant 27 : index
    %c0_25 = arith.constant 0 : index
    %22 = vector.load %arg1[%c0_24, %c27, %c0_25] : memref<1x81x16xbf16, #tpu.memory_space<vmem>>, vector<1x8x16xbf16>
    %23 = vector.shape_cast %22 : vector<1x8x16xbf16> to vector<8x16xbf16>
    %c24 = arith.constant 24 : index
    %c0_26 = arith.constant 0 : index
    %24 = vector.load %arg5[%c24, %c0_26] : memref<64x128xf32, #tpu.memory_space<vmem>>, vector<8x128xf32>
    %cst_27 = arith.constant dense<0.000000e+00> : vector<8x128xf32>
    %25 = tpu.matmul %23, %3, %cst_27 {dimension_numbers = #tpu.dot_dimension_numbers<[1], [0], [0], [1], [0, 0, 1, 1], [], []>} : vector<8x16xbf16>, vector<16x128xbf16>, vector<8x128xf32> -> vector<8x128xf32>
    %26 = arith.addf %24, %25 : vector<8x128xf32>
    %c24_28 = arith.constant 24 : index
    %c0_29 = arith.constant 0 : index
    %27 = vector.load %arg5[%c24_28, %c0_29] : memref<64x128xf32, #tpu.memory_space<vmem>>, vector<8x128xf32>
    tpu.vector_store %arg5[%c24_28, %c0_29], %26 {strides = array<i32>} : memref<64x128xf32, #tpu.memory_space<vmem>>, vector<8x128xf32>,
    %c0_30 = arith.constant 0 : index
    %c36 = arith.constant 36 : index
    %c0_31 = arith.constant 0 : index
    %28 = vector.load %arg1[%c0_30, %c36, %c0_31] : memref<1x81x16xbf16, #tpu.memory_space<vmem>>, vector<1x8x16xbf16>
    %29 = vector.shape_cast %28 : vector<1x8x16xbf16> to vector<8x16xbf16>
    %c32 = arith.constant 32 : index
    %c0_32 = arith.constant 0 : index
    %30 = vector.load %arg5[%c32, %c0_32] : memref<64x128xf32, #tpu.memory_space<vmem>>, vector<8x128xf32>
    %cst_33 = arith.constant dense<0.000000e+00> : vector<8x128xf32>
    %31 = tpu.matmul %29, %3, %cst_33 {dimension_numbers = #tpu.dot_dimension_numbers<[1], [0], [0], [1], [0, 0, 1, 1], [], []>} : vector<8x16xbf16>, vector<16x128xbf16>, vector<8x128xf32> -> vector<8x128xf32>
    %32 = arith.addf %30, %31 : vector<8x128xf32>
    %c32_34 = arith.constant 32 : index
    %c0_35 = arith.constant 0 : index
    %33 = vector.load %arg5[%c32_34, %c0_35] : memref<64x128xf32, #tpu.memory_space<vmem>>, vector<8x128xf32>
    tpu.vector_store %arg5[%c32_34, %c0_35], %32 {strides = array<i32>} : memref<64x128xf32, #tpu.memory_space<vmem>>, vector<8x128xf32>,
    %c0_36 = arith.constant 0 : index
    %c45 = arith.constant 45 : index
    %c0_37 = arith.constant 0 : index
    %34 = vector.load %arg1[%c0_36, %c45, %c0_37] : memref<1x81x16xbf16, #tpu.memory_space<vmem>>, vector<1x8x16xbf16>
    %35 = vector.shape_cast %34 : vector<1x8x16xbf16> to vector<8x16xbf16>
    %c40 = arith.constant 40 : index
    %c0_38 = arith.constant 0 : index
    %36 = vector.load %arg5[%c40, %c0_38] : memref<64x128xf32, #tpu.memory_space<vmem>>, vector<8x128xf32>
    %cst_39 = arith.constant dense<0.000000e+00> : vector<8x128xf32>
    %37 = tpu.matmul %35, %3, %cst_39 {dimension_numbers = #tpu.dot_dimension_numbers<[1], [0], [0], [1], [0, 0, 1, 1], [], []>} : vector<8x16xbf16>, vector<16x128xbf16>, vector<8x128xf32> -> vector<8x128xf32>
    %38 = arith.addf %36, %37 : vector<8x128xf32>
    %c40_40 = arith.constant 40 : index
    %c0_41 = arith.constant 0 : index
    %39 = vector.load %arg5[%c40_40, %c0_41] : memref<64x128xf32, #tpu.memory_space<vmem>>, vector<8x128xf32>
    tpu.vector_store %arg5[%c40_40, %c0_41], %38 {strides = array<i32>} : memref<64x128xf32, #tpu.memory_space<vmem>>, vector<8x128xf32>,
    %c0_42 = arith.constant 0 : index
    %c54 = arith.constant 54 : index
    %c0_43 = arith.constant 0 : index
    %40 = vector.load %arg1[%c0_42, %c54, %c0_43] : memref<1x81x16xbf16, #tpu.memory_space<vmem>>, vector<1x8x16xbf16>
    %41 = vector.shape_cast %40 : vector<1x8x16xbf16> to vector<8x16xbf16>
    %c48 = arith.constant 48 : index
    %c0_44 = arith.constant 0 : index
    %42 = vector.load %arg5[%c48, %c0_44] : memref<64x128xf32, #tpu.memory_space<vmem>>, vector<8x128xf32>
    %cst_45 = arith.constant dense<0.000000e+00> : vector<8x128xf32>
    %43 = tpu.matmul %41, %3, %cst_45 {dimension_numbers = #tpu.dot_dimension_numbers<[1], [0], [0], [1], [0, 0, 1, 1], [], []>} : vector<8x16xbf16>, vector<16x128xbf16>, vector<8x128xf32> -> vector<8x128xf32>
    %44 = arith.addf %42, %43 : vector<8x128xf32>
    %c48_46 = arith.constant 48 : index
    %c0_47 = arith.constant 0 : index
    %45 = vector.load %arg5[%c48_46, %c0_47] : memref<64x128xf32, #tpu.memory_space<vmem>>, vector<8x128xf32>
    tpu.vector_store %arg5[%c48_46, %c0_47], %44 {strides = array<i32>} : memref<64x128xf32, #tpu.memory_space<vmem>>, vector<8x128xf32>,
    %c0_48 = arith.constant 0 : index
    %c63 = arith.constant 63 : index
    %c0_49 = arith.constant 0 : index
    %46 = vector.load %arg1[%c0_48, %c63, %c0_49] : memref<1x81x16xbf16, #tpu.memory_space<vmem>>, vector<1x8x16xbf16>
    %47 = vector.shape_cast %46 : vector<1x8x16xbf16> to vector<8x16xbf16>
    %c56 = arith.constant 56 : index
    %c0_50 = arith.constant 0 : index
    %48 = vector.load %arg5[%c56, %c0_50] : memref<64x128xf32, #tpu.memory_space<vmem>>, vector<8x128xf32>
    %cst_51 = arith.constant dense<0.000000e+00> : vector<8x128xf32>
    %49 = tpu.matmul %47, %3, %cst_51 {dimension_numbers = #tpu.dot_dimension_numbers<[1], [0], [0], [1], [0, 0, 1, 1], [], []>} : vector<8x16xbf16>, vector<16x128xbf16>, vector<8x128xf32> -> vector<8x128xf32>
    %50 = arith.addf %48, %49 : vector<8x128xf32>
    %c56_52 = arith.constant 56 : index
    %c0_53 = arith.constant 0 : index
    %51 = vector.load %arg5[%c56_52, %c0_53] : memref<64x128xf32, #tpu.memory_space<vmem>>, vector<8x128xf32>
    tpu.vector_store %arg5[%c56_52, %c0_53], %50 {strides = array<i32>} : memref<64x128xf32, #tpu.memory_space<vmem>>, vector<8x128xf32>,
    %c1 = arith.constant 1 : index
    %c0_54 = arith.constant 0 : index
    %c0_55 = arith.constant 0 : index
    %52 = vector.load %arg2[%c1, %c0_54, %c0_55] : memref<4x16x128xbf16, #tpu.memory_space<vmem>>, vector<1x16x128xbf16>
    %53 = vector.shape_cast %52 : vector<1x16x128xbf16> to vector<16x128xbf16>
    %c0_56 = arith.constant 0 : index
    %c1_57 = arith.constant 1 : index
    %c0_58 = arith.constant 0 : index
    %54 = vector.load %arg1[%c0_56, %c1_57, %c0_58] : memref<1x81x16xbf16, #tpu.memory_space<vmem>>, vector<1x8x16xbf16>
    %55 = vector.shape_cast %54 : vector<1x8x16xbf16> to vector<8x16xbf16>
    %c0_59 = arith.constant 0 : index
    %c0_60 = arith.constant 0 : index
    %56 = vector.load %arg5[%c0_59, %c0_60] : memref<64x128xf32, #tpu.memory_space<vmem>>, vector<8x128xf32>
    %cst_61 = arith.constant dense<0.000000e+00> : vector<8x128xf32>
    %57 = tpu.matmul %55, %53, %cst_61 {dimension_numbers = #tpu.dot_dimension_numbers<[1], [0], [0], [1], [0, 0, 1, 1], [], []>} : vector<8x16xbf16>, vector<16x128xbf16>, vector<8x128xf32> -> vector<8x128xf32>
    %58 = arith.addf %56, %57 : vector<8x128xf32>
    %c0_62 = arith.constant 0 : index
    %c0_63 = arith.constant 0 : index
    %59 = vector.load %arg5[%c0_62, %c0_63] : memref<64x128xf32, #tpu.memory_space<vmem>>, vector<8x128xf32>
    tpu.vector_store %arg5[%c0_62, %c0_63], %58 {strides = array<i32>} : memref<64x128xf32, #tpu.memory_space<vmem>>, vector<8x128xf32>,
    %c0_64 = arith.constant 0 : index
    %c10 = arith.constant 10 : index
    %c0_65 = arith.constant 0 : index
    %60 = vector.load %arg1[%c0_64, %c10, %c0_65] : memref<1x81x16xbf16, #tpu.memory_space<vmem>>, vector<1x8x16xbf16>
    %61 = vector.shape_cast %60 : vector<1x8x16xbf16> to vector<8x16xbf16>
    %c8_66 = arith.constant 8 : index
    %c0_67 = arith.constant 0 : index
    %62 = vector.load %arg5[%c8_66, %c0_67] : memref<64x128xf32, #tpu.memory_space<vmem>>, vector<8x128xf32>
    %cst_68 = arith.constant dense<0.000000e+00> : vector<8x128xf32>
    %63 = tpu.matmul %61, %53, %cst_68 {dimension_numbers = #tpu.dot_dimension_numbers<[1], [0], [0], [1], [0, 0, 1, 1], [], []>} : vector<8x16xbf16>, vector<16x128xbf16>, vector<8x128xf32> -> vector<8x128xf32>
    %64 = arith.addf %62, %63 : vector<8x128xf32>
    %c8_69 = arith.constant 8 : index
    %c0_70 = arith.constant 0 : index
    %65 = vector.load %arg5[%c8_69, %c0_70] : memref<64x128xf32, #tpu.memory_space<vmem>>, vector<8x128xf32>
    tpu.vector_store %arg5[%c8_69, %c0_70], %64 {strides = array<i32>} : memref<64x128xf32, #tpu.memory_space<vmem>>, vector<8x128xf32>,
    %c0_71 = arith.constant 0 : index
    %c19 = arith.constant 19 : index
    %c0_72 = arith.constant 0 : index
    %66 = vector.load %arg1[%c0_71, %c19, %c0_72] : memref<1x81x16xbf16, #tpu.memory_space<vmem>>, vector<1x8x16xbf16>
    %67 = vector.shape_cast %66 : vector<1x8x16xbf16> to vector<8x16xbf16>
    %c16_73 = arith.constant 16 : index
    %c0_74 = arith.constant 0 : index
    %68 = vector.load %arg5[%c16_73, %c0_74] : memref<64x128xf32, #tpu.memory_space<vmem>>, vector<8x128xf32>
    %cst_75 = arith.constant dense<0.000000e+00> : vector<8x128xf32>
    %69 = tpu.matmul %67, %53, %cst_75 {dimension_numbers = #tpu.dot_dimension_numbers<[1], [0], [0], [1], [0, 0, 1, 1], [], []>} : vector<8x16xbf16>, vector<16x128xbf16>, vector<8x128xf32> -> vector<8x128xf32>
    %70 = arith.addf %68, %69 : vector<8x128xf32>
    %c16_76 = arith.constant 16 : index
    %c0_77 = arith.constant 0 : index
    %71 = vector.load %arg5[%c16_76, %c0_77] : memref<64x128xf32, #tpu.memory_space<vmem>>, vector<8x128xf32>
    tpu.vector_store %arg5[%c16_76, %c0_77], %70 {strides = array<i32>} : memref<64x128xf32, #tpu.memory_space<vmem>>, vector<8x128xf32>,
    %c0_78 = arith.constant 0 : index
    %c28 = arith.constant 28 : index
    %c0_79 = arith.constant 0 : index
    %72 = vector.load %arg1[%c0_78, %c28, %c0_79] : memref<1x81x16xbf16, #tpu.memory_space<vmem>>, vector<1x8x16xbf16>
    %73 = vector.shape_cast %72 : vector<1x8x16xbf16> to vector<8x16xbf16>
    %c24_80 = arith.constant 24 : index
    %c0_81 = arith.constant 0 : index
    %74 = vector.load %arg5[%c24_80, %c0_81] : memref<64x128xf32, #tpu.memory_space<vmem>>, vector<8x128xf32>
    %cst_82 = arith.constant dense<0.000000e+00> : vector<8x128xf32>
    %75 = tpu.matmul %73, %53, %cst_82 {dimension_numbers = #tpu.dot_dimension_numbers<[1], [0], [0], [1], [0, 0, 1, 1], [], []>} : vector<8x16xbf16>, vector<16x128xbf16>, vector<8x128xf32> -> vector<8x128xf32>
    %76 = arith.addf %74, %75 : vector<8x128xf32>
    %c24_83 = arith.constant 24 : index
    %c0_84 = arith.constant 0 : index
    %77 = vector.load %arg5[%c24_83, %c0_84] : memref<64x128xf32, #tpu.memory_space<vmem>>, vector<8x128xf32>
    tpu.vector_store %arg5[%c24_83, %c0_84], %76 {strides = array<i32>} : memref<64x128xf32, #tpu.memory_space<vmem>>, vector<8x128xf32>,
    %c0_85 = arith.constant 0 : index
    %c37 = arith.constant 37 : index
    %c0_86 = arith.constant 0 : index
    %78 = vector.load %arg1[%c0_85, %c37, %c0_86] : memref<1x81x16xbf16, #tpu.memory_space<vmem>>, vector<1x8x16xbf16>
    %79 = vector.shape_cast %78 : vector<1x8x16xbf16> to vector<8x16xbf16>
    %c32_87 = arith.constant 32 : index
    %c0_88 = arith.constant 0 : index
    %80 = vector.load %arg5[%c32_87, %c0_88] : memref<64x128xf32, #tpu.memory_space<vmem>>, vector<8x128xf32>
    %cst_89 = arith.constant dense<0.000000e+00> : vector<8x128xf32>
    %81 = tpu.matmul %79, %53, %cst_89 {dimension_numbers = #tpu.dot_dimension_numbers<[1], [0], [0], [1], [0, 0, 1, 1], [], []>} : vector<8x16xbf16>, vector<16x128xbf16>, vector<8x128xf32> -> vector<8x128xf32>
    %82 = arith.addf %80, %81 : vector<8x128xf32>
    %c32_90 = arith.constant 32 : index
    %c0_91 = arith.constant 0 : index
    %83 = vector.load %arg5[%c32_90, %c0_91] : memref<64x128xf32, #tpu.memory_space<vmem>>, vector<8x128xf32>
    tpu.vector_store %arg5[%c32_90, %c0_91], %82 {strides = array<i32>} : memref<64x128xf32, #tpu.memory_space<vmem>>, vector<8x128xf32>,
    %c0_92 = arith.constant 0 : index
    %c46 = arith.constant 46 : index
    %c0_93 = arith.constant 0 : index
    %84 = vector.load %arg1[%c0_92, %c46, %c0_93] : memref<1x81x16xbf16, #tpu.memory_space<vmem>>, vector<1x8x16xbf16>
    %85 = vector.shape_cast %84 : vector<1x8x16xbf16> to vector<8x16xbf16>
    %c40_94 = arith.constant 40 : index
    %c0_95 = arith.constant 0 : index
    %86 = vector.load %arg5[%c40_94, %c0_95] : memref<64x128xf32, #tpu.memory_space<vmem>>, vector<8x128xf32>
    %cst_96 = arith.constant dense<0.000000e+00> : vector<8x128xf32>
    %87 = tpu.matmul %85, %53, %cst_96 {dimension_numbers = #tpu.dot_dimension_numbers<[1], [0], [0], [1], [0, 0, 1, 1], [], []>} : vector<8x16xbf16>, vector<16x128xbf16>, vector<8x128xf32> -> vector<8x128xf32>
    %88 = arith.addf %86, %87 : vector<8x128xf32>
    %c40_97 = arith.constant 40 : index
    %c0_98 = arith.constant 0 : index
    %89 = vector.load %arg5[%c40_97, %c0_98] : memref<64x128xf32, #tpu.memory_space<vmem>>, vector<8x128xf32>
    tpu.vector_store %arg5[%c40_97, %c0_98], %88 {strides = array<i32>} : memref<64x128xf32, #tpu.memory_space<vmem>>, vector<8x128xf32>,
    %c0_99 = arith.constant 0 : index
    %c55 = arith.constant 55 : index
    %c0_100 = arith.constant 0 : index
    %90 = vector.load %arg1[%c0_99, %c55, %c0_100] : memref<1x81x16xbf16, #tpu.memory_space<vmem>>, vector<1x8x16xbf16>
    %91 = vector.shape_cast %90 : vector<1x8x16xbf16> to vector<8x16xbf16>
    %c48_101 = arith.constant 48 : index
    %c0_102 = arith.constant 0 : index
    %92 = vector.load %arg5[%c48_101, %c0_102] : memref<64x128xf32, #tpu.memory_space<vmem>>, vector<8x128xf32>
    %cst_103 = arith.constant dense<0.000000e+00> : vector<8x128xf32>
    %93 = tpu.matmul %91, %53, %cst_103 {dimension_numbers = #tpu.dot_dimension_numbers<[1], [0], [0], [1], [0, 0, 1, 1], [], []>} : vector<8x16xbf16>, vector<16x128xbf16>, vector<8x128xf32> -> vector<8x128xf32>
    %94 = arith.addf %92, %93 : vector<8x128xf32>
    %c48_104 = arith.constant 48 : index
    %c0_105 = arith.constant 0 : index
    %95 = vector.load %arg5[%c48_104, %c0_105] : memref<64x128xf32, #tpu.memory_space<vmem>>, vector<8x128xf32>
    tpu.vector_store %arg5[%c48_104, %c0_105], %94 {strides = array<i32>} : memref<64x128xf32, #tpu.memory_space<vmem>>, vector<8x128xf32>,
    %c0_106 = arith.constant 0 : index
    %c64 = arith.constant 64 : index
    %c0_107 = arith.constant 0 : index
    %96 = vector.load %arg1[%c0_106, %c64, %c0_107] : memref<1x81x16xbf16, #tpu.memory_space<vmem>>, vector<1x8x16xbf16>
    %97 = vector.shape_cast %96 : vector<1x8x16xbf16> to vector<8x16xbf16>
    %c56_108 = arith.constant 56 : index
    %c0_109 = arith.constant 0 : index
    %98 = vector.load %arg5[%c56_108, %c0_109] : memref<64x128xf32, #tpu.memory_space<vmem>>, vector<8x128xf32>
    %cst_110 = arith.constant dense<0.000000e+00> : vector<8x128xf32>
    %99 = tpu.matmul %97, %53, %cst_110 {dimension_numbers = #tpu.dot_dimension_numbers<[1], [0], [0], [1], [0, 0, 1, 1], [], []>} : vector<8x16xbf16>, vector<16x128xbf16>, vector<8x128xf32> -> vector<8x128xf32>
    %100 = arith.addf %98, %99 : vector<8x128xf32>
    %c56_111 = arith.constant 56 : index
    %c0_112 = arith.constant 0 : index
    %101 = vector.load %arg5[%c56_111, %c0_112] : memref<64x128xf32, #tpu.memory_space<vmem>>, vector<8x128xf32>
    tpu.vector_store %arg5[%c56_111, %c0_112], %100 {strides = array<i32>} : memref<64x128xf32, #tpu.memory_space<vmem>>, vector<8x128xf32>,
    %c2 = arith.constant 2 : index
    %c0_113 = arith.constant 0 : index
    %c0_114 = arith.constant 0 : index
    %102 = vector.load %arg2[%c2, %c0_113, %c0_114] : memref<4x16x128xbf16, #tpu.memory_space<vmem>>, vector<1x16x128xbf16>
    %103 = vector.shape_cast %102 : vector<1x16x128xbf16> to vector<16x128xbf16>
    %c0_115 = arith.constant 0 : index
    %c9_116 = arith.constant 9 : index
    %c0_117 = arith.constant 0 : index
    %104 = vector.load %arg1[%c0_115, %c9_116, %c0_117] : memref<1x81x16xbf16, #tpu.memory_space<vmem>>, vector<1x8x16xbf16>
    %105 = vector.shape_cast %104 : vector<1x8x16xbf16> to vector<8x16xbf16>
    %c0_118 = arith.constant 0 : index
    %c0_119 = arith.constant 0 : index
    %106 = vector.load %arg5[%c0_118, %c0_119] : memref<64x128xf32, #tpu.memory_space<vmem>>, vector<8x128xf32>
    %cst_120 = arith.constant dense<0.000000e+00> : vector<8x128xf32>
    %107 = tpu.matmul %105, %103, %cst_120 {dimension_numbers = #tpu.dot_dimension_numbers<[1], [0], [0], [1], [0, 0, 1, 1], [], []>} : vector<8x16xbf16>, vector<16x128xbf16>, vector<8x128xf32> -> vector<8x128xf32>
    %108 = arith.addf %106, %107 : vector<8x128xf32>
    %c0_121 = arith.constant 0 : index
    %c0_122 = arith.constant 0 : index
    %109 = vector.load %arg5[%c0_121, %c0_122] : memref<64x128xf32, #tpu.memory_space<vmem>>, vector<8x128xf32>
    tpu.vector_store %arg5[%c0_121, %c0_122], %108 {strides = array<i32>} : memref<64x128xf32, #tpu.memory_space<vmem>>, vector<8x128xf32>,
    %c0_123 = arith.constant 0 : index
    %c18_124 = arith.constant 18 : index
    %c0_125 = arith.constant 0 : index
    %110 = vector.load %arg1[%c0_123, %c18_124, %c0_125] : memref<1x81x16xbf16, #tpu.memory_space<vmem>>, vector<1x8x16xbf16>
    %111 = vector.shape_cast %110 : vector<1x8x16xbf16> to vector<8x16xbf16>
    %c8_126 = arith.constant 8 : index
    %c0_127 = arith.constant 0 : index
    %112 = vector.load %arg5[%c8_126, %c0_127] : memref<64x128xf32, #tpu.memory_space<vmem>>, vector<8x128xf32>
    %cst_128 = arith.constant dense<0.000000e+00> : vector<8x128xf32>
    %113 = tpu.matmul %111, %103, %cst_128 {dimension_numbers = #tpu.dot_dimension_numbers<[1], [0], [0], [1], [0, 0, 1, 1], [], []>} : vector<8x16xbf16>, vector<16x128xbf16>, vector<8x128xf32> -> vector<8x128xf32>
    %114 = arith.addf %112, %113 : vector<8x128xf32>
    %c8_129 = arith.constant 8 : index
    %c0_130 = arith.constant 0 : index
    %115 = vector.load %arg5[%c8_129, %c0_130] : memref<64x128xf32, #tpu.memory_space<vmem>>, vector<8x128xf32>
    tpu.vector_store %arg5[%c8_129, %c0_130], %114 {strides = array<i32>} : memref<64x128xf32, #tpu.memory_space<vmem>>, vector<8x128xf32>,
    %c0_131 = arith.constant 0 : index
    %c27_132 = arith.constant 27 : index
    %c0_133 = arith.constant 0 : index
    %116 = vector.load %arg1[%c0_131, %c27_132, %c0_133] : memref<1x81x16xbf16, #tpu.memory_space<vmem>>, vector<1x8x16xbf16>
    %117 = vector.shape_cast %116 : vector<1x8x16xbf16> to vector<8x16xbf16>
    %c16_134 = arith.constant 16 : index
    %c0_135 = arith.constant 0 : index
    %118 = vector.load %arg5[%c16_134, %c0_135] : memref<64x128xf32, #tpu.memory_space<vmem>>, vector<8x128xf32>
    %cst_136 = arith.constant dense<0.000000e+00> : vector<8x128xf32>
    %119 = tpu.matmul %117, %103, %cst_136 {dimension_numbers = #tpu.dot_dimension_numbers<[1], [0], [0], [1], [0, 0, 1, 1], [], []>} : vector<8x16xbf16>, vector<16x128xbf16>, vector<8x128xf32> -> vector<8x128xf32>
    %120 = arith.addf %118, %119 : vector<8x128xf32>
    %c16_137 = arith.constant 16 : index
    %c0_138 = arith.constant 0 : index
    %121 = vector.load %arg5[%c16_137, %c0_138] : memref<64x128xf32, #tpu.memory_space<vmem>>, vector<8x128xf32>
    tpu.vector_store %arg5[%c16_137, %c0_138], %120 {strides = array<i32>} : memref<64x128xf32, #tpu.memory_space<vmem>>, vector<8x128xf32>,
    %c0_139 = arith.constant 0 : index
    %c36_140 = arith.constant 36 : index
    %c0_141 = arith.constant 0 : index
    %122 = vector.load %arg1[%c0_139, %c36_140, %c0_141] : memref<1x81x16xbf16, #tpu.memory_space<vmem>>, vector<1x8x16xbf16>
    %123 = vector.shape_cast %122 : vector<1x8x16xbf16> to vector<8x16xbf16>
    %c24_142 = arith.constant 24 : index
    %c0_143 = arith.constant 0 : index
    %124 = vector.load %arg5[%c24_142, %c0_143] : memref<64x128xf32, #tpu.memory_space<vmem>>, vector<8x128xf32>
    %cst_144 = arith.constant dense<0.000000e+00> : vector<8x128xf32>
    %125 = tpu.matmul %123, %103, %cst_144 {dimension_numbers = #tpu.dot_dimension_numbers<[1], [0], [0], [1], [0, 0, 1, 1], [], []>} : vector<8x16xbf16>, vector<16x128xbf16>, vector<8x128xf32> -> vector<8x128xf32>
    %126 = arith.addf %124, %125 : vector<8x128xf32>
    %c24_145 = arith.constant 24 : index
    %c0_146 = arith.constant 0 : index
    %127 = vector.load %arg5[%c24_145, %c0_146] : memref<64x128xf32, #tpu.memory_space<vmem>>, vector<8x128xf32>
    tpu.vector_store %arg5[%c24_145, %c0_146], %126 {strides = array<i32>} : memref<64x128xf32, #tpu.memory_space<vmem>>, vector<8x128xf32>,
    %c0_147 = arith.constant 0 : index
    %c45_148 = arith.constant 45 : index
    %c0_149 = arith.constant 0 : index
    %128 = vector.load %arg1[%c0_147, %c45_148, %c0_149] : memref<1x81x16xbf16, #tpu.memory_space<vmem>>, vector<1x8x16xbf16>
    %129 = vector.shape_cast %128 : vector<1x8x16xbf16> to vector<8x16xbf16>
    %c32_150 = arith.constant 32 : index
    %c0_151 = arith.constant 0 : index
    %130 = vector.load %arg5[%c32_150, %c0_151] : memref<64x128xf32, #tpu.memory_space<vmem>>, vector<8x128xf32>
    %cst_152 = arith.constant dense<0.000000e+00> : vector<8x128xf32>
    %131 = tpu.matmul %129, %103, %cst_152 {dimension_numbers = #tpu.dot_dimension_numbers<[1], [0], [0], [1], [0, 0, 1, 1], [], []>} : vector<8x16xbf16>, vector<16x128xbf16>, vector<8x128xf32> -> vector<8x128xf32>
    %132 = arith.addf %130, %131 : vector<8x128xf32>
    %c32_153 = arith.constant 32 : index
    %c0_154 = arith.constant 0 : index
    %133 = vector.load %arg5[%c32_153, %c0_154] : memref<64x128xf32, #tpu.memory_space<vmem>>, vector<8x128xf32>
    tpu.vector_store %arg5[%c32_153, %c0_154], %132 {strides = array<i32>} : memref<64x128xf32, #tpu.memory_space<vmem>>, vector<8x128xf32>,
    %c0_155 = arith.constant 0 : index
    %c54_156 = arith.constant 54 : index
    %c0_157 = arith.constant 0 : index
    %134 = vector.load %arg1[%c0_155, %c54_156, %c0_157] : memref<1x81x16xbf16, #tpu.memory_space<vmem>>, vector<1x8x16xbf16>
    %135 = vector.shape_cast %134 : vector<1x8x16xbf16> to vector<8x16xbf16>
    %c40_158 = arith.constant 40 : index
    %c0_159 = arith.constant 0 : index
    %136 = vector.load %arg5[%c40_158, %c0_159] : memref<64x128xf32, #tpu.memory_space<vmem>>, vector<8x128xf32>
    %cst_160 = arith.constant dense<0.000000e+00> : vector<8x128xf32>
    %137 = tpu.matmul %135, %103, %cst_160 {dimension_numbers = #tpu.dot_dimension_numbers<[1], [0], [0], [1], [0, 0, 1, 1], [], []>} : vector<8x16xbf16>, vector<16x128xbf16>, vector<8x128xf32> -> vector<8x128xf32>
    %138 = arith.addf %136, %137 : vector<8x128xf32>
    %c40_161 = arith.constant 40 : index
    %c0_162 = arith.constant 0 : index
    %139 = vector.load %arg5[%c40_161, %c0_162] : memref<64x128xf32, #tpu.memory_space<vmem>>, vector<8x128xf32>
    tpu.vector_store %arg5[%c40_161, %c0_162], %138 {strides = array<i32>} : memref<64x128xf32, #tpu.memory_space<vmem>>, vector<8x128xf32>,
    %c0_163 = arith.constant 0 : index
    %c63_164 = arith.constant 63 : index
    %c0_165 = arith.constant 0 : index
    %140 = vector.load %arg1[%c0_163, %c63_164, %c0_165] : memref<1x81x16xbf16, #tpu.memory_space<vmem>>, vector<1x8x16xbf16>
    %141 = vector.shape_cast %140 : vector<1x8x16xbf16> to vector<8x16xbf16>
    %c48_166 = arith.constant 48 : index
    %c0_167 = arith.constant 0 : index
    %142 = vector.load %arg5[%c48_166, %c0_167] : memref<64x128xf32, #tpu.memory_space<vmem>>, vector<8x128xf32>
    %cst_168 = arith.constant dense<0.000000e+00> : vector<8x128xf32>
    %143 = tpu.matmul %141, %103, %cst_168 {dimension_numbers = #tpu.dot_dimension_numbers<[1], [0], [0], [1], [0, 0, 1, 1], [], []>} : vector<8x16xbf16>, vector<16x128xbf16>, vector<8x128xf32> -> vector<8x128xf32>
    %144 = arith.addf %142, %143 : vector<8x128xf32>
    %c48_169 = arith.constant 48 : index
    %c0_170 = arith.constant 0 : index
    %145 = vector.load %arg5[%c48_169, %c0_170] : memref<64x128xf32, #tpu.memory_space<vmem>>, vector<8x128xf32>
    tpu.vector_store %arg5[%c48_169, %c0_170], %144 {strides = array<i32>} : memref<64x128xf32, #tpu.memory_space<vmem>>, vector<8x128xf32>,
    %c0_171 = arith.constant 0 : index
    %c72 = arith.constant 72 : index
    %c0_172 = arith.constant 0 : index
    %146 = vector.load %arg1[%c0_171, %c72, %c0_172] : memref<1x81x16xbf16, #tpu.memory_space<vmem>>, vector<1x8x16xbf16>
    %147 = vector.shape_cast %146 : vector<1x8x16xbf16> to vector<8x16xbf16>
    %c56_173 = arith.constant 56 : index
    %c0_174 = arith.constant 0 : index
    %148 = vector.load %arg5[%c56_173, %c0_174] : memref<64x128xf32, #tpu.memory_space<vmem>>, vector<8x128xf32>
    %cst_175 = arith.constant dense<0.000000e+00> : vector<8x128xf32>
    %149 = tpu.matmul %147, %103, %cst_175 {dimension_numbers = #tpu.dot_dimension_numbers<[1], [0], [0], [1], [0, 0, 1, 1], [], []>} : vector<8x16xbf16>, vector<16x128xbf16>, vector<8x128xf32> -> vector<8x128xf32>
    %150 = arith.addf %148, %149 : vector<8x128xf32>
    %c56_176 = arith.constant 56 : index
    %c0_177 = arith.constant 0 : index
    %151 = vector.load %arg5[%c56_176, %c0_177] : memref<64x128xf32, #tpu.memory_space<vmem>>, vector<8x128xf32>
    tpu.vector_store %arg5[%c56_176, %c0_177], %150 {strides = array<i32>} : memref<64x128xf32, #tpu.memory_space<vmem>>, vector<8x128xf32>,
    %c3 = arith.constant 3 : index
    %c0_178 = arith.constant 0 : index
    %c0_179 = arith.constant 0 : index
    %152 = vector.load %arg2[%c3, %c0_178, %c0_179] : memref<4x16x128xbf16, #tpu.memory_space<vmem>>, vector<1x16x128xbf16>
    %153 = vector.shape_cast %152 : vector<1x16x128xbf16> to vector<16x128xbf16>
    %c0_180 = arith.constant 0 : index
    %c10_181 = arith.constant 10 : index
    %c0_182 = arith.constant 0 : index
    %154 = vector.load %arg1[%c0_180, %c10_181, %c0_182] : memref<1x81x16xbf16, #tpu.memory_space<vmem>>, vector<1x8x16xbf16>
    %155 = vector.shape_cast %154 : vector<1x8x16xbf16> to vector<8x16xbf16>
    %c0_183 = arith.constant 0 : index
    %c0_184 = arith.constant 0 : index
    %156 = vector.load %arg5[%c0_183, %c0_184] : memref<64x128xf32, #tpu.memory_space<vmem>>, vector<8x128xf32>
    %cst_185 = arith.constant dense<0.000000e+00> : vector<8x128xf32>
    %157 = tpu.matmul %155, %153, %cst_185 {dimension_numbers = #tpu.dot_dimension_numbers<[1], [0], [0], [1], [0, 0, 1, 1], [], []>} : vector<8x16xbf16>, vector<16x128xbf16>, vector<8x128xf32> -> vector<8x128xf32>
    %158 = arith.addf %156, %157 : vector<8x128xf32>
    %c0_186 = arith.constant 0 : index
    %c0_187 = arith.constant 0 : index
    %159 = vector.load %arg5[%c0_186, %c0_187] : memref<64x128xf32, #tpu.memory_space<vmem>>, vector<8x128xf32>
    tpu.vector_store %arg5[%c0_186, %c0_187], %158 {strides = array<i32>} : memref<64x128xf32, #tpu.memory_space<vmem>>, vector<8x128xf32>,
    %c0_188 = arith.constant 0 : index
    %c19_189 = arith.constant 19 : index
    %c0_190 = arith.constant 0 : index
    %160 = vector.load %arg1[%c0_188, %c19_189, %c0_190] : memref<1x81x16xbf16, #tpu.memory_space<vmem>>, vector<1x8x16xbf16>
    %161 = vector.shape_cast %160 : vector<1x8x16xbf16> to vector<8x16xbf16>
    %c8_191 = arith.constant 8 : index
    %c0_192 = arith.constant 0 : index
    %162 = vector.load %arg5[%c8_191, %c0_192] : memref<64x128xf32, #tpu.memory_space<vmem>>, vector<8x128xf32>
    %cst_193 = arith.constant dense<0.000000e+00> : vector<8x128xf32>
    %163 = tpu.matmul %161, %153, %cst_193 {dimension_numbers = #tpu.dot_dimension_numbers<[1], [0], [0], [1], [0, 0, 1, 1], [], []>} : vector<8x16xbf16>, vector<16x128xbf16>, vector<8x128xf32> -> vector<8x128xf32>
    %164 = arith.addf %162, %163 : vector<8x128xf32>
    %c8_194 = arith.constant 8 : index
    %c0_195 = arith.constant 0 : index
    %165 = vector.load %arg5[%c8_194, %c0_195] : memref<64x128xf32, #tpu.memory_space<vmem>>, vector<8x128xf32>
    tpu.vector_store %arg5[%c8_194, %c0_195], %164 {strides = array<i32>} : memref<64x128xf32, #tpu.memory_space<vmem>>, vector<8x128xf32>,
    %c0_196 = arith.constant 0 : index
    %c28_197 = arith.constant 28 : index
    %c0_198 = arith.constant 0 : index
    %166 = vector.load %arg1[%c0_196, %c28_197, %c0_198] : memref<1x81x16xbf16, #tpu.memory_space<vmem>>, vector<1x8x16xbf16>
    %167 = vector.shape_cast %166 : vector<1x8x16xbf16> to vector<8x16xbf16>
    %c16_199 = arith.constant 16 : index
    %c0_200 = arith.constant 0 : index
    %168 = vector.load %arg5[%c16_199, %c0_200] : memref<64x128xf32, #tpu.memory_space<vmem>>, vector<8x128xf32>
    %cst_201 = arith.constant dense<0.000000e+00> : vector<8x128xf32>
    %169 = tpu.matmul %167, %153, %cst_201 {dimension_numbers = #tpu.dot_dimension_numbers<[1], [0], [0], [1], [0, 0, 1, 1], [], []>} : vector<8x16xbf16>, vector<16x128xbf16>, vector<8x128xf32> -> vector<8x128xf32>
    %170 = arith.addf %168, %169 : vector<8x128xf32>
    %c16_202 = arith.constant 16 : index
    %c0_203 = arith.constant 0 : index
    %171 = vector.load %arg5[%c16_202, %c0_203] : memref<64x128xf32, #tpu.memory_space<vmem>>, vector<8x128xf32>
    tpu.vector_store %arg5[%c16_202, %c0_203], %170 {strides = array<i32>} : memref<64x128xf32, #tpu.memory_space<vmem>>, vector<8x128xf32>,
    %c0_204 = arith.constant 0 : index
    %c37_205 = arith.constant 37 : index
    %c0_206 = arith.constant 0 : index
    %172 = vector.load %arg1[%c0_204, %c37_205, %c0_206] : memref<1x81x16xbf16, #tpu.memory_space<vmem>>, vector<1x8x16xbf16>
    %173 = vector.shape_cast %172 : vector<1x8x16xbf16> to vector<8x16xbf16>
    %c24_207 = arith.constant 24 : index
    %c0_208 = arith.constant 0 : index
    %174 = vector.load %arg5[%c24_207, %c0_208] : memref<64x128xf32, #tpu.memory_space<vmem>>, vector<8x128xf32>
    %cst_209 = arith.constant dense<0.000000e+00> : vector<8x128xf32>
    %175 = tpu.matmul %173, %153, %cst_209 {dimension_numbers = #tpu.dot_dimension_numbers<[1], [0], [0], [1], [0, 0, 1, 1], [], []>} : vector<8x16xbf16>, vector<16x128xbf16>, vector<8x128xf32> -> vector<8x128xf32>
    %176 = arith.addf %174, %175 : vector<8x128xf32>
    %c24_210 = arith.constant 24 : index
    %c0_211 = arith.constant 0 : index
    %177 = vector.load %arg5[%c24_210, %c0_211] : memref<64x128xf32, #tpu.memory_space<vmem>>, vector<8x128xf32>
    tpu.vector_store %arg5[%c24_210, %c0_211], %176 {strides = array<i32>} : memref<64x128xf32, #tpu.memory_space<vmem>>, vector<8x128xf32>,
    %c0_212 = arith.constant 0 : index
    %c46_213 = arith.constant 46 : index
    %c0_214 = arith.constant 0 : index
    %178 = vector.load %arg1[%c0_212, %c46_213, %c0_214] : memref<1x81x16xbf16, #tpu.memory_space<vmem>>, vector<1x8x16xbf16>
    %179 = vector.shape_cast %178 : vector<1x8x16xbf16> to vector<8x16xbf16>
    %c32_215 = arith.constant 32 : index
    %c0_216 = arith.constant 0 : index
    %180 = vector.load %arg5[%c32_215, %c0_216] : memref<64x128xf32, #tpu.memory_space<vmem>>, vector<8x128xf32>
    %cst_217 = arith.constant dense<0.000000e+00> : vector<8x128xf32>
    %181 = tpu.matmul %179, %153, %cst_217 {dimension_numbers = #tpu.dot_dimension_numbers<[1], [0], [0], [1], [0, 0, 1, 1], [], []>} : vector<8x16xbf16>, vector<16x128xbf16>, vector<8x128xf32> -> vector<8x128xf32>
    %182 = arith.addf %180, %181 : vector<8x128xf32>
    %c32_218 = arith.constant 32 : index
    %c0_219 = arith.constant 0 : index
    %183 = vector.load %arg5[%c32_218, %c0_219] : memref<64x128xf32, #tpu.memory_space<vmem>>, vector<8x128xf32>
    tpu.vector_store %arg5[%c32_218, %c0_219], %182 {strides = array<i32>} : memref<64x128xf32, #tpu.memory_space<vmem>>, vector<8x128xf32>,
    %c0_220 = arith.constant 0 : index
    %c55_221 = arith.constant 55 : index
    %c0_222 = arith.constant 0 : index
    %184 = vector.load %arg1[%c0_220, %c55_221, %c0_222] : memref<1x81x16xbf16, #tpu.memory_space<vmem>>, vector<1x8x16xbf16>
    %185 = vector.shape_cast %184 : vector<1x8x16xbf16> to vector<8x16xbf16>
    %c40_223 = arith.constant 40 : index
    %c0_224 = arith.constant 0 : index
    %186 = vector.load %arg5[%c40_223, %c0_224] : memref<64x128xf32, #tpu.memory_space<vmem>>, vector<8x128xf32>
    %cst_225 = arith.constant dense<0.000000e+00> : vector<8x128xf32>
    %187 = tpu.matmul %185, %153, %cst_225 {dimension_numbers = #tpu.dot_dimension_numbers<[1], [0], [0], [1], [0, 0, 1, 1], [], []>} : vector<8x16xbf16>, vector<16x128xbf16>, vector<8x128xf32> -> vector<8x128xf32>
    %188 = arith.addf %186, %187 : vector<8x128xf32>
    %c40_226 = arith.constant 40 : index
    %c0_227 = arith.constant 0 : index
    %189 = vector.load %arg5[%c40_226, %c0_227] : memref<64x128xf32, #tpu.memory_space<vmem>>, vector<8x128xf32>
    tpu.vector_store %arg5[%c40_226, %c0_227], %188 {strides = array<i32>} : memref<64x128xf32, #tpu.memory_space<vmem>>, vector<8x128xf32>,
    %c0_228 = arith.constant 0 : index
    %c64_229 = arith.constant 64 : index
    %c0_230 = arith.constant 0 : index
    %190 = vector.load %arg1[%c0_228, %c64_229, %c0_230] : memref<1x81x16xbf16, #tpu.memory_space<vmem>>, vector<1x8x16xbf16>
    %191 = vector.shape_cast %190 : vector<1x8x16xbf16> to vector<8x16xbf16>
    %c48_231 = arith.constant 48 : index
    %c0_232 = arith.constant 0 : index
    %192 = vector.load %arg5[%c48_231, %c0_232] : memref<64x128xf32, #tpu.memory_space<vmem>>, vector<8x128xf32>
    %cst_233 = arith.constant dense<0.000000e+00> : vector<8x128xf32>
    %193 = tpu.matmul %191, %153, %cst_233 {dimension_numbers = #tpu.dot_dimension_numbers<[1], [0], [0], [1], [0, 0, 1, 1], [], []>} : vector<8x16xbf16>, vector<16x128xbf16>, vector<8x128xf32> -> vector<8x128xf32>
    %194 = arith.addf %192, %193 : vector<8x128xf32>
    %c48_234 = arith.constant 48 : index
    %c0_235 = arith.constant 0 : index
    %195 = vector.load %arg5[%c48_234, %c0_235] : memref<64x128xf32, #tpu.memory_space<vmem>>, vector<8x128xf32>
    tpu.vector_store %arg5[%c48_234, %c0_235], %194 {strides = array<i32>} : memref<64x128xf32, #tpu.memory_space<vmem>>, vector<8x128xf32>,
    %c0_236 = arith.constant 0 : index
    %c73 = arith.constant 73 : index
    %c0_237 = arith.constant 0 : index
    %196 = vector.load %arg1[%c0_236, %c73, %c0_237] : memref<1x81x16xbf16, #tpu.memory_space<vmem>>, vector<1x8x16xbf16>
    %197 = vector.shape_cast %196 : vector<1x8x16xbf16> to vector<8x16xbf16>
    %c56_238 = arith.constant 56 : index
    %c0_239 = arith.constant 0 : index
    %198 = vector.load %arg5[%c56_238, %c0_239] : memref<64x128xf32, #tpu.memory_space<vmem>>, vector<8x128xf32>
    %cst_240 = arith.constant dense<0.000000e+00> : vector<8x128xf32>
    %199 = tpu.matmul %197, %153, %cst_240 {dimension_numbers = #tpu.dot_dimension_numbers<[1], [0], [0], [1], [0, 0, 1, 1], [], []>} : vector<8x16xbf16>, vector<16x128xbf16>, vector<8x128xf32> -> vector<8x128xf32>
    %200 = arith.addf %198, %199 : vector<8x128xf32>
    %c56_241 = arith.constant 56 : index
    %c0_242 = arith.constant 0 : index
    %201 = vector.load %arg5[%c56_241, %c0_242] : memref<64x128xf32, #tpu.memory_space<vmem>>, vector<8x128xf32>
    tpu.vector_store %arg5[%c56_241, %c0_242], %200 {strides = array<i32>} : memref<64x128xf32, #tpu.memory_space<vmem>>, vector<8x128xf32>,
    %c0_243 = arith.constant 0 : index
    %c0_244 = arith.constant 0 : index
    %202 = vector.load %arg5[%c0_243, %c0_244] : memref<64x128xf32, #tpu.memory_space<vmem>>, vector<64x32xf32>
    %c0_245 = arith.constant 0 : index
    %c0_246 = arith.constant 0 : index
    %203 = vector.load %arg3[%c0_245, %c0_246] : memref<1x32xf32, #tpu.memory_space<vmem>>, vector<1x32xf32>
    %204 = vector.broadcast %203 : vector<1x32xf32> to vector<64x32xf32>
    %205 = arith.addf %202, %204 : vector<64x32xf32>
    %206 = tpu.transpose %205, [1, 0] : vector<64x32xf32> -> vector<32x64xf32>
    %c0_247 = arith.constant 0 : index
    %c0_248 = arith.constant 0 : index
    %c0_249 = arith.constant 0 : index
    %207 = vector.load %arg4[%c0_247, %c0_248, %c0_249] : memref<1x32x64xf32, #tpu.memory_space<vmem>>, vector<1x32x64xf32>
    %208 = vector.shape_cast %207 : vector<1x32x64xf32> to vector<32x64xf32>
    %209 = vector.shape_cast %206 : vector<32x64xf32> to vector<1x32x64xf32>
    tpu.vector_store %arg4[%c0_247, %c0_248, %c0_249], %209 {strides = array<i32>} : memref<1x32x64xf32, #tpu.memory_space<vmem>>, vector<1x32x64xf32>,
    return
  }
  func.func @transform_0(%arg0: i32) -> (i32, i32, i32) {
    %c0_i32 = arith.constant 0 : i32
    %c0_i32_0 = arith.constant 0 : i32
    %c0_i32_1 = arith.constant 0 : i32
    return %arg0, %c0_i32, %c0_i32_0 : i32, i32, i32
  }
  func.func @transform_1(%arg0: i32) -> (i32, i32, i32) {
    %c0_i32 = arith.constant 0 : i32
    %c0_i32_0 = arith.constant 0 : i32
    %c0_i32_1 = arith.constant 0 : i32
    %c0_i32_2 = arith.constant 0 : i32
    return %c0_i32, %c0_i32_0, %c0_i32_1 : i32, i32, i32
  }
  func.func @transform_2(%arg0: i32) -> (i32, i32) {
    %c0_i32 = arith.constant 0 : i32
    %c0_i32_0 = arith.constant 0 : i32
    %c0_i32_1 = arith.constant 0 : i32
    return %c0_i32, %c0_i32_0 : i32, i32
  }
  func.func @transform_3(%arg0: i32) -> (i32, i32, i32) {
    %c0_i32 = arith.constant 0 : i32
    %c0_i32_0 = arith.constant 0 : i32
    %c0_i32_1 = arith.constant 0 : i32
    return %arg0, %c0_i32, %c0_i32_0 : i32, i32, i32
  }
}

</mosaic_0001>

<bundles_post_ra>
// kernel: conv_embedding_forward.1
= control target key start
LH: loop header
LB: loop body
LE: loop exit
PB: predicated region body
PF: predicated region fallthrough
CT: control target
= control target key end

     0   :  { %s2550_s12 = smov 0   ;;  %s2837_s0 = inlined_call_operand.vmem [shape: bf16[2,81,16], index: 0, kind: input, shape index: {}]   ;;  %s2838_s1 = inlined_call_operand.vmem [shape: bf16[4,16,128], index: 1, kind: input, shape index: {}]   ;;  %s2839_s2 = inlined_call_operand.vmem [shape: f32[1,32], index: 2, kind: input, shape index: {}]   ;;  %s2840_s3 = inlined_call_operand.vmem [shape: f32[2,32,64], index: 3, kind: output, shape index: {}]  }
   0x1 LB: > { %s2139_s13 = sadd.s32 4294967295, %s2526_s12   ;;  %p2143_p0 = scmp.ge.s32.totalorder %s2526_s12, 1  ;;  %s2526_s12 = sphi %s2550_s12, %s13_s12  }
   0x2   : > { %p137_p1 = scmp.lt.s32.totalorder %s2526_s12, 3 }
   0x4   : > { %p138_p2 = pnand %p2143_p0, %p137_p1 }
   0x5   : > { %p161_p3 = scmp.lt.s32.totalorder (!%p138_p2), %s2139_s13, 1 }
   0x6   : > { %141 = sbr.rel (%p138_p2) target bundleno = 449 (0x1c1), region = 32 }
   0xb   : > { %v2561_v0 = vld [vmem:[%s2838_s1] sm:$0xff]   ;;  %v2528_v1 = vmov 0.0   ;;  %vm2529_vm0 = vmmov 0   ;;  %s2842_s13 = smov (!%p161_p3, %s2139_s13), 1  ;;  %vm190_vm1 = vcmask 130048   ;;  %v2618_v31 = vld [vmem:[%s2838_s1 + $0x8] sm:$0xff]  }
   0xc   : > { %2285 = vmatprep.subr.bf16.mxu0 %v2528_v1  ;;  %2291 = vmatprep.subr.bf16.mxu1 %v2528_v1  ;;  %s2477_s16 = smul.u32 44, %s2842_s13  ;;  %s2220_s28 = sshll.u32 %s2842_s13, 5  ;;  %vm2079_vm2 = vcmask 523264  }
   0xd   : > { %2286 = vmatpush3.bf16.msra.mxu0 %v2561_v0  ;;  %2287 = vmatprep.mubr.msk.bf16.mxu0 %vm2529_vm0, %v2528_v1  ;;  %s170_s4 = scalar_lea.vmem %s2840_s3, %s2220_s28 }
   0xe   : > { %2297 = vmatprep.subr.bf16.mxu0 %v2528_v1  ;;  %2292 = vmatpush3.bf16.msra.mxu1 %v2561_v0  ;;  %s2579_s19 = scalar_lea.vmem %s2837_s0, %s2477_s16 }
   0xf   : > { %2293 = vmatprep.mubr.msk.bf16.mxu1 %vm2529_vm0, %v2528_v1  ;;  %2303 = vmatprep.subr.bf16.mxu1 %v2528_v1  ;;  %v182_v2 = vld [vmem:[%s2579_s19] sm:$0xf]  ;;  %v2489_v3 = vld [vmem:[%s2579_s19 + $0x4] sm:$0x1f]   ;;  %v2490_v4 = vld [vmem:[%s2579_s19 + $0x8] sm:$0x1e]  }
  0x10   : > { %2288 = vmatmul.mubr.msk.bf16.vlgmr.msra.gmra.mxu0 %vm190_vm1, %v182_v2  ;;  %v245_v5 = vshrl.u32 %v2489_v3, 16  ;;  %v247_v6 = vshll.u32 %v2489_v3, 16  ;;  %v2491_v7 = vld [vmem:[%s2579_s19 + $0xc] sm:$0x3e]   ;;  %v304_v9 = vrot.slane %v2490_v4, 1 }
  0x11   : > { %2298 = vmatpush3.bf16.msra.mxu0 %v2561_v0  ;;  %2299 = vmatprep.mubr.msk.bf16.mxu0 %vm2529_vm0, %v2528_v1  ;;  %v359_v10 = vshrl.u32 %v2491_v7, 16  ;;  %v362_v11 = vshll.u32 %v2491_v7, 16  ;;  %v2492_v13 = vld [vmem:[%s2579_s19 + $0x10] sm:$0x3c]   ;;  %v2493_v14 = vld [vmem:[%s2579_s19 + $0x14] sm:$0x7c]  }
  0x12   : > { %2309 = vmatprep.subr.bf16.mxu0 %v2528_v1  ;;  %v249_v8 = vrot.slane %v247_v6, 1  ;;  %v419_v18 = vrot.slane %v2492_v13, 2  ;;  %v474_v19 = vshrl.u32 %v2493_v14, 16  ;;  %v477_v20 = vshll.u32 %v2493_v14, 16  ;;  %v2494_v21 = vld [vmem:[%s2579_s19 + $0x18] sm:$0x78]  }
  0x13   : > { %v361_v15 = vrot.slane %v359_v10, 1  ;;  %v364_v16 = vrot.slane %v362_v11, 2  ;;  %v2496_v22 = vld [vmem:[%s2579_s19 + $0x1c] sm:$0xf8]   ;;  %v534_v29 = vrot.slane %v2494_v21, 3 }
  0x14   : > { %v250_v12 = vor.u32 %v249_v8, %v245_v5  ;;  %v476_v23 = vrot.slane %v474_v19, 2  ;;  %v479_v24 = vrot.slane %v477_v20, 3  ;;  %v2497_v25 = vld [vmem:[%s2579_s19] sm:$0x1f]   ;;  %v589_v26 = vshrl.u32 %v2496_v22, 16 }
  0x15   : > { %v365_v17 = vor.u32 %v364_v16, %v361_v15  ;;  %v592_v27 = vshll.u32 %v2496_v22, 16  ;;  %v655_v30 = vshll.u32 %v2497_v25, 16  ;;  %v653_v34 = vshrl.u32 %v2497_v25, 16  ;;  %v2499_v36 = vld [vmem:[%s2579_s19 + $0x8] sm:$0x3e]  }
  0x16   : > { %2294 = vmatmul.mubr.msk.bf16.vlgmr.msra.gmra.mxu1 %vm190_vm1, %v250_v12  ;;  %v480_v28 = vor.u32 %v479_v24, %v476_v23  ;;  %v591_v32 = vrot.slane %v589_v26, 3  ;;  %v773_v39 = vshrl.u32 %v2499_v36, 16  ;;  %v776_v40 = vshll.u32 %v2499_v36, 16  ;;  %v2498_v41 = vld [vmem:[%s2579_s19 + $0x4] sm:$0x1e]  }
  0x17   : > { %2304 = vmatpush3.bf16.msra.mxu1 %v2561_v0  ;;  %2305 = vmatprep.mubr.msk.bf16.mxu1 %vm2529_vm0, %v2528_v1  ;;  %v594_v33 = vrot.slane %v592_v27, 4  ;;  %v657_v35 = vrot.slane %v655_v30, 1  ;;  %v2501_v44 = vld [vmem:[%s2579_s19 + $0x10] sm:$0x7c]   ;;  %v718_v45 = vrot.slane %v2498_v41, 1  ;;  %v2722_v30 = vld [vmem:[%s2838_s1 + $0x18] sm:$0xff]  }
  0x18   : > { %2300 = vmatmul.mubr.msk.bf16.vlgmr.msra.gmra.mxu0 %vm190_vm1, %v304_v9  ;;  %2315 = vmatprep.subr.bf16.mxu1 %v2528_v1  ;;  %v775_v42 = vrot.slane %v773_v39, 1  ;;  %v778_v43 = vrot.slane %v776_v40, 2  ;;  %v888_v47 = vshrl.u32 %v2501_v44, 16  ;;  %v891_v48 = vshll.u32 %v2501_v44, 16  ;;  %v2500_v49 = vld [vmem:[%s2579_s19 + $0xc] sm:$0x3c]  }
  0x19   : > { %2310 = vmatpush3.bf16.msra.mxu0 %v2561_v0  ;;  %2311 = vmatprep.mubr.msk.bf16.mxu0 %vm2529_vm0, %v2528_v1  ;;  %v595_v37 = vor.u32 %v594_v33, %v591_v32  ;;  %v658_v38 = vor.u32 %v657_v35, %v653_v34  ;;  %v2503_v52 = vld [vmem:[%s2579_s19 + $0x18] sm:$0xf8]   ;;  %v833_v53 = vrot.slane %v2500_v49, 2  ;;  %v2502_v57 = vld [vmem:[%s2579_s19 + $0x14] sm:$0x78]  }
  0x1a   : > { %2321 = vmatprep.subr.bf16.mxu0 %v2528_v1  ;;  %v779_v46 = vor.u32 %v778_v43, %v775_v42  ;;  %v890_v50 = vrot.slane %v888_v47, 2  ;;  %v893_v51 = vrot.slane %v891_v48, 3  ;;  %v1003_v55 = vshrl.u32 %v2503_v52, 16  ;;  %v2505_v60 = vld [vmem:[%s2579_s19 + $0x4] sm:$0x1f]  }
  0x1b   : > { %v1006_v56 = vshll.u32 %v2503_v52, 16  ;;  %v948_v61 = vrot.slane %v2502_v57, 3  ;;  %v1116_v63 = vshll.u32 %v2505_v60, 16  ;;  %v1114_v2 = vshrl.u32 %v2505_v60, 16  ;;  %v2507_v4 = vld [vmem:[%s2579_s19 + $0xc] sm:$0x3e]  }
  0x1c   : > { %v894_v54 = vor.u32 %v893_v51, %v890_v50  ;;  %v1005_v58 = vrot.slane %v1003_v55, 3  ;;  %v1234_v6 = vshrl.u32 %v2507_v4, 16  ;;  %v1237_v7 = vshll.u32 %v2507_v4, 16  ;;  %v1055_v8 = vld [vmem:[%s2579_s19 + $0x20] sm:$0xf] }
  0x1d   : > { %v1008_v59 = vrot.slane %v1006_v56, 4  ;;  %v1118_v3 = vrot.slane %v1116_v63, 1  ;;  %v2506_v9 = vld [vmem:[%s2579_s19 + $0x8] sm:$0x1e]   ;;  %v2509_v12 = vld [vmem:[%s2579_s19 + $0x14] sm:$0x7c]  }
  0x1e   : > { %2306 = vmatmul.mubr.msk.bf16.vlgmr.msra.gmra.mxu1 %vm190_vm1, %v365_v17  ;;  %v1236_v10 = vrot.slane %v1234_v6, 1  ;;  %v1239_v11 = vrot.slane %v1237_v7, 2  ;;  %v1179_v13 = vrot.slane %v2506_v9, 1  ;;  %v1349_v15 = vshrl.u32 %v2509_v12, 16  ;;  %v2508_v17 = vld [vmem:[%s2579_s19 + $0x10] sm:$0x3c]  }
  0x1f   : > { %2316 = vmatpush3.bf16.msra.mxu1 %v2561_v0  ;;  %2317 = vmatprep.mubr.msk.bf16.mxu1 %vm2529_vm0, %v2528_v1  ;;  %v1009_v62 = vor.u32 %v1008_v59, %v1005_v58  ;;  %v1119_v5 = vor.u32 %v1118_v3, %v1114_v2  ;;  %v1352_v16 = vshll.u32 %v2509_v12, 16  ;;  %v2511_v20 = vld [vmem:[%s2579_s19 + $0x1c] sm:$0xf8]   ;;  %v1294_v21 = vrot.slane %v2508_v17, 2  ;;  %v2510_v25 = vld [vmem:[%s2579_s19 + $0x18] sm:$0x78]  }
  0x20   : > { %2312 = vmatmul.mubr.msk.bf16.vlgmr.msra.gmra.mxu0 %vm190_vm1, %v419_v18  ;;  %2327 = vmatprep.subr.bf16.mxu1 %v2528_v1  ;;  %v1240_v14 = vor.u32 %v1239_v11, %v1236_v10  ;;  %v1351_v18 = vrot.slane %v1349_v15, 2  ;;  %v1464_v23 = vshrl.u32 %v2511_v20, 16  ;;  %v1467_v24 = vshll.u32 %v2511_v20, 16  ;;  %v2514_v32 = vld [vmem:[%s2579_s19 + $0x8] sm:$0x3e]  }
  0x21   : > { %2322 = vmatpush3.bf16.msra.mxu0 %v2561_v0  ;;  %2323 = vmatprep.mubr.msk.bf16.mxu0 %vm2529_vm0, %v2528_v1  ;;  %v1354_v19 = vrot.slane %v1352_v16, 3  ;;  %v1635_v34 = vshrl.u32 %v2514_v32, 16  ;;  %v1638_v35 = vshll.u32 %v2514_v32, 16  ;;  %v1516_v36 = vld [vmem:[%s2579_s19 + $0x24] sm:$0xf] }
  0x22   : > { %2333 = vmatprep.subr.bf16.mxu0 %v2528_v1  ;;  %v1466_v26 = vrot.slane %v1464_v23, 3  ;;  %v1469_v27 = vrot.slane %v1467_v24, 4  ;;  %v2515_v39 = vld [vmem:[%s2579_s19 + $0xc] sm:$0x3c]   ;;  %v2516_v40 = vld [vmem:[%s2579_s19 + $0x10] sm:$0x7c]  }
  0x23   : > { %v1355_v22 = vor.u32 %v1354_v19, %v1351_v18  ;;  %v1695_v42 = vrot.slane %v2515_v39, 2  ;;  %v1750_v43 = vshrl.u32 %v2516_v40, 16  ;;  %v1753_v44 = vshll.u32 %v2516_v40, 16  ;;  %v2517_v47 = vld [vmem:[%s2579_s19 + $0x14] sm:$0x78]  }
  0x24   : > { %v2518_v48 = vld [vmem:[%s2579_s19 + $0x18] sm:$0xf8]   ;;  %v1810_v50 = vrot.slane %v2517_v47, 3  ;;  %v2519_v55 = vld [vmem:[%s2579_s19 + $0x24] sm:$0x1f]  }
  0x25   : > { %v1865_v51 = vshrl.u32 %v2518_v48, 16  ;;  %v1868_v52 = vshll.u32 %v2518_v48, 16  ;;  %v1975_v57 = vshll.u32 %v2519_v55, 16  ;;  %v1917_v58 = vld [vmem:[%s2579_s19 + $0x20] sm:$0xf]  ;;  %v1973_v59 = vshrl.u32 %v2519_v55, 16 }
  0x26   : > { %2318 = vmatmul.mubr.msk.bf16.vlgmr.msra.gmra.mxu1 %vm190_vm1, %v480_v28  ;;  %v1409_v28 = vrot.slane %v2510_v25, 3 }
  0x27   : > { %2328 = vmatpush3.bf16.msra.mxu1 %v2561_v0  ;;  %2329 = vmatprep.mubr.msk.bf16.mxu1 %vm2529_vm0, %v2528_v1  ;;  %v2670_v0 = vld [vmem:[%s2838_s1 + $0x10] sm:$0xff]   ;;  %v1977_v60 = vrot.slane %v1975_v57, 1 }
  0x28   : > { %2324 = vmatmul.mubr.msk.bf16.vlgmr.msra.gmra.mxu0 %vm190_vm1, %v534_v29  ;;  %2339 = vmatprep.subr.bf16.mxu1 %v2528_v1  ;;  %v1470_v29 = vor.u32 %v1469_v27, %v1466_v26 }
  0x29   : > { %2334 = vmatpush3.bf16.msra.mxu0 %v2618_v31  ;;  %2335 = vmatprep.mubr.msk.bf16.mxu0 %vm2529_vm0, %v2528_v1 }
  0x2a   : > { %2345 = vmatprep.subr.bf16.mxu0 %v2528_v1 }
  0x2e   : > { %2330 = vmatmul.mubr.msk.bf16.vlgmr.msra.gmra.mxu1 %vm190_vm1, %v595_v37  ;;  %v1637_v37 = vrot.slane %v1635_v34, 1 }
  0x2f   : > { %2340 = vmatpush3.bf16.msra.mxu1 %v2618_v31  ;;  %2341 = vmatprep.mubr.msk.bf16.mxu1 %vm2529_vm0, %v2528_v1 }
  0x30   : > { %2336 = vmatmul.mubr.msk.bf16.vlgmr.msra.gmra.mxu0 %vm190_vm1, %v658_v38  ;;  %2351 = vmatprep.subr.bf16.mxu1 %v2528_v1  ;;  %v1640_v38 = vrot.slane %v1638_v35, 2 }
  0x31   : > { %2346 = vmatpush3.bf16.msra.mxu0 %v2618_v31  ;;  %2347 = vmatprep.mubr.msk.bf16.mxu0 %vm2529_vm0, %v2528_v1 }
  0x32   : > { %2357 = vmatprep.subr.bf16.mxu0 %v2528_v1  ;;  %v1641_v41 = vor.u32 %v1640_v38, %v1637_v37 }
  0x36   : > { %2342 = vmatmul.mubr.msk.bf16.vlgmr.msra.gmra.mxu1 %vm190_vm1, %v718_v45  ;;  %v1752_v45 = vrot.slane %v1750_v43, 2 }
  0x37   : > { %2352 = vmatpush3.bf16.msra.mxu1 %v2618_v31  ;;  %2353 = vmatprep.mubr.msk.bf16.mxu1 %vm2529_vm0, %v2528_v1 }
  0x38   : > { %2348 = vmatmul.mubr.msk.bf16.vlgmr.msra.gmra.mxu0 %vm190_vm1, %v779_v46  ;;  %2363 = vmatprep.subr.bf16.mxu1 %v2528_v1  ;;  %v1755_v46 = vrot.slane %v1753_v44, 3 }
  0x39   : > { %2358 = vmatpush3.bf16.msra.mxu0 %v2618_v31  ;;  %2359 = vmatprep.mubr.msk.bf16.mxu0 %vm2529_vm0, %v2528_v1 }
  0x3a   : > { %2369 = vmatprep.subr.bf16.mxu0 %v2528_v1  ;;  %v1756_v49 = vor.u32 %v1755_v46, %v1752_v45 }
  0x3e   : > { %2354 = vmatmul.mubr.msk.bf16.vlgmr.msra.gmra.mxu1 %vm190_vm1, %v833_v53  ;;  %v1867_v53 = vrot.slane %v1865_v51, 3 }
  0x3f   : > { %2364 = vmatpush3.bf16.msra.mxu1 %v2618_v31  ;;  %2365 = vmatprep.mubr.msk.bf16.mxu1 %vm2529_vm0, %v2528_v1 }
  0x40   : > { %2360 = vmatmul.mubr.msk.bf16.vlgmr.msra.gmra.mxu0 %vm190_vm1, %v894_v54  ;;  %2375 = vmatprep.subr.bf16.mxu1 %v2528_v1  ;;  %v1870_v54 = vrot.slane %v1868_v52, 4 }
  0x41   : > { %2370 = vmatpush3.bf16.msra.mxu0 %v2618_v31  ;;  %2371 = vmatprep.mubr.msk.bf16.mxu0 %vm2529_vm0, %v2528_v1 }
  0x42   : > { %2381 = vmatprep.subr.bf16.mxu0 %v2528_v1  ;;  %v1871_v56 = vor.u32 %v1870_v54, %v1867_v53 }
  0x46   : > { %2366 = vmatmul.mubr.msk.bf16.vlgmr.msra.gmra.mxu1 %vm190_vm1, %v948_v61  ;;  %v1978_v61 = vor.u32 %v1977_v60, %v1973_v59 }
  0x47   : > { %2376 = vmatpush3.bf16.msra.mxu1 %v2618_v31  ;;  %2377 = vmatprep.mubr.msk.bf16.mxu1 %vm2529_vm0, %v2528_v1  ;;  %v2513_v31 = vld [vmem:[%s2579_s19 + $0x4] sm:$0x1e]  }
  0x48   : > { %2372 = vmatmul.mubr.msk.bf16.vlgmr.msra.gmra.mxu0 %vm190_vm1, %v1009_v62  ;;  %2387 = vmatprep.subr.bf16.mxu1 %v2528_v1  ;;  %v1574_v33 = vrot.slane %v2513_v31, 1 }
  0x49   : > { %2382 = vmatpush3.bf16.msra.mxu0 %v2670_v0  ;;  %2383 = vmatprep.mubr.msk.bf16.mxu0 %vm2529_vm0, %v2528_v1 }
  0x4a   : > { %2393 = vmatprep.subr.bf16.mxu0 %v2528_v1 }
  0x4e   : > { %2378 = vmatmul.mubr.msk.bf16.vlgmr.msra.gmra.mxu1 %vm190_vm1, %v1055_v8 }
  0x4f   : > { %2388 = vmatpush3.bf16.msra.mxu1 %v2670_v0  ;;  %2389 = vmatprep.mubr.msk.bf16.mxu1 %vm2529_vm0, %v2528_v1 }
  0x50   : > { %2384 = vmatmul.mubr.msk.bf16.vlgmr.msra.gmra.mxu0 %vm190_vm1, %v1119_v5  ;;  %2399 = vmatprep.subr.bf16.mxu1 %v2528_v1 }
  0x51   : > { %2394 = vmatpush3.bf16.msra.mxu0 %v2670_v0  ;;  %2395 = vmatprep.mubr.msk.bf16.mxu0 %vm2529_vm0, %v2528_v1 }
  0x52   : > { %2405 = vmatprep.subr.bf16.mxu0 %v2528_v1 }
  0x56   : > { %2390 = vmatmul.mubr.msk.bf16.vlgmr.msra.gmra.mxu1 %vm190_vm1, %v1179_v13 }
  0x57   : > { %2400 = vmatpush3.bf16.msra.mxu1 %v2670_v0  ;;  %2401 = vmatprep.mubr.msk.bf16.mxu1 %vm2529_vm0, %v2528_v1 }
  0x58   : > { %2396 = vmatmul.mubr.msk.bf16.vlgmr.msra.gmra.mxu0 %vm190_vm1, %v1240_v14  ;;  %2411 = vmatprep.subr.bf16.mxu1 %v2528_v1 }
  0x59   : > { %2406 = vmatpush3.bf16.msra.mxu0 %v2670_v0  ;;  %2407 = vmatprep.mubr.msk.bf16.mxu0 %vm2529_vm0, %v2528_v1 }
  0x5a   : > { %2417 = vmatprep.subr.bf16.mxu0 %v2528_v1 }
  0x5e   : > { %2402 = vmatmul.mubr.msk.bf16.vlgmr.msra.gmra.mxu1 %vm190_vm1, %v1294_v21 }
  0x5f   : > { %2412 = vmatpush3.bf16.msra.mxu1 %v2670_v0  ;;  %2413 = vmatprep.mubr.msk.bf16.mxu1 %vm2529_vm0, %v2528_v1 }
  0x60   : > { %2408 = vmatmul.mubr.msk.bf16.vlgmr.msra.gmra.mxu0 %vm190_vm1, %v1355_v22  ;;  %2423 = vmatprep.subr.bf16.mxu1 %v2528_v1 }
  0x61   : > { %2418 = vmatpush3.bf16.msra.mxu0 %v2670_v0  ;;  %2419 = vmatprep.mubr.msk.bf16.mxu0 %vm2529_vm0, %v2528_v1 }
  0x62   : > { %2429 = vmatprep.subr.bf16.mxu0 %v2528_v1 }
  0x66   : > { %2414 = vmatmul.mubr.msk.bf16.vlgmr.msra.gmra.mxu1 %vm190_vm1, %v1409_v28 }
  0x67   : > { %2424 = vmatpush3.bf16.msra.mxu1 %v2670_v0  ;;  %2425 = vmatprep.mubr.msk.bf16.mxu1 %vm2529_vm0, %v2528_v1 }
  0x68   : > { %2420 = vmatmul.mubr.msk.bf16.vlgmr.msra.gmra.mxu0 %vm190_vm1, %v1470_v29  ;;  %2435 = vmatprep.subr.bf16.mxu1 %v2528_v1 }
  0x69   : > { %2430 = vmatpush3.bf16.msra.mxu0 %v2722_v30  ;;  %2431 = vmatprep.mubr.msk.bf16.mxu0 %vm2529_vm0, %v2528_v1 }
  0x6a   : > { %2441 = vmatprep.subr.bf16.mxu0 %v2528_v1 }
  0x6e   : > { %2426 = vmatmul.mubr.msk.bf16.vlgmr.msra.gmra.mxu1 %vm190_vm1, %v1516_v36 }
  0x6f   : > { %2436 = vmatpush3.bf16.msra.mxu1 %v2722_v30  ;;  %2437 = vmatprep.mubr.msk.bf16.mxu1 %vm2529_vm0, %v2528_v1 }
  0x70   : > { %2432 = vmatmul.mubr.msk.bf16.vlgmr.msra.gmra.mxu0 %vm190_vm1, %v1574_v33  ;;  %2447 = vmatprep.subr.bf16.mxu1 %v2528_v1 }
  0x71   : > { %2442 = vmatpush3.bf16.msra.mxu0 %v2722_v30  ;;  %2443 = vmatprep.mubr.msk.bf16.mxu0 %vm2529_vm0, %v2528_v1 }
  0x72   : > { %2453 = vmatprep.subr.bf16.mxu0 %v2528_v1 }
  0x76   : > { %2438 = vmatmul.mubr.msk.bf16.vlgmr.msra.gmra.mxu1 %vm190_vm1, %v1641_v41 }
  0x77   : > { %2448 = vmatpush3.bf16.msra.mxu1 %v2722_v30  ;;  %2449 = vmatprep.mubr.msk.bf16.mxu1 %vm2529_vm0, %v2528_v1 }
  0x78   : > { %2444 = vmatmul.mubr.msk.bf16.vlgmr.msra.gmra.mxu0 %vm190_vm1, %v1695_v42  ;;  %2459 = vmatprep.subr.bf16.mxu1 %v2528_v1 }
  0x79   : > { %2454 = vmatpush3.bf16.msra.mxu0 %v2722_v30  ;;  %2455 = vmatprep.mubr.msk.bf16.mxu0 %vm2529_vm0, %v2528_v1 }
  0x7a   : > { %2465 = vmatprep.subr.bf16.mxu0 %v2528_v1 }
  0x7e   : > { %2450 = vmatmul.mubr.msk.bf16.vlgmr.msra.gmra.mxu1 %vm190_vm1, %v1756_v49 }
  0x7f   : > { %2460 = vmatpush3.bf16.msra.mxu1 %v2722_v30  ;;  %2461 = vmatprep.mubr.msk.bf16.mxu1 %vm2529_vm0, %v2528_v1 }
  0x80   : > { %2456 = vmatmul.mubr.msk.bf16.vlgmr.msra.gmra.mxu0 %vm190_vm1, %v1810_v50  ;;  %2471 = vmatprep.subr.bf16.mxu1 %v2528_v1 }
  0x81   : > { %2466 = vmatpush3.bf16.msra.mxu0 %v2722_v30  ;;  %2467 = vmatprep.mubr.msk.bf16.mxu0 %vm2529_vm0, %v2528_v1 }
  0x86   : > { %2462 = vmatmul.mubr.msk.bf16.vlgmr.msra.gmra.mxu1 %vm190_vm1, %v1871_v56 }
  0x87   : > { %2472 = vmatpush3.bf16.msra.mxu1 %v2722_v30  ;;  %2473 = vmatprep.mubr.msk.bf16.mxu1 %vm2529_vm0, %v2528_v1 }
  0x88   : > { %2468 = vmatmul.mubr.msk.bf16.vlgmr.msra.gmra.mxu0 %vm190_vm1, %v1917_v58 }
  0x8e   : > { %2474 = vmatmul.mubr.msk.bf16.vlgmr.msra.gmra.mxu1 %vm190_vm1, %v1978_v61 }
  0xd0   : > { %v2778_v62 = vpop.f32.mrf.mxu0 }
  0xd2   : > { %v2289_v63 = vpop.f32.mrf.mxu0 }
  0xd4   : > { %v231_v0 = vpop.f32.mrf.mxu0 }
  0xd6   : > { %v2290_v2 = vpop.f32.mrf.mxu0  ;;  %v2780_v3 = vpop.f32.mrf.mxu1 }
  0xd8   : > { %v342_v4 = vpop.f32.mrf.mxu0  ;;  %v2295_v5 = vpop.f32.mrf.mxu1 }
  0xda   : > { %v2301_v6 = vpop.f32.mrf.mxu0  ;;  %v291_v7 = vpop.f32.mrf.mxu1 }
  0xdc   : > { %v345_v8 = vpop.f32.mrf.mxu0  ;;  %v2296_v9 = vpop.f32.mrf.mxu1 }
  0xde   : > { %v2302_v10 = vpop.f32.mrf.mxu0  ;;  %v2782_v11 = vpop.f32.mrf.mxu1 }
  0xe0   : > { %v457_v1 = vpop.f32.mrf.mxu0  ;;  %v2307_v12 = vpop.f32.mrf.mxu1 }
  0xe2   : > { %v2313_v13 = vpop.f32.mrf.mxu0  ;;  %v406_v14 = vpop.f32.mrf.mxu1 }
  0xe4   : > { %v460_v15 = vpop.f32.mrf.mxu0  ;;  %v2308_v16 = vpop.f32.mrf.mxu1 }
  0xe6   : > { %v2314_v17 = vpop.f32.mrf.mxu0  ;;  %v2784_v18 = vpop.f32.mrf.mxu1 }
  0xe8   : > { %v572_v19 = vpop.f32.mrf.mxu0  ;;  %v2319_v20 = vpop.f32.mrf.mxu1 }
  0xea   : > { %v2325_v21 = vpop.f32.mrf.mxu0  ;;  %v521_v22 = vpop.f32.mrf.mxu1 }
  0xec   : > { %v575_v23 = vpop.f32.mrf.mxu0  ;;  %v2320_v24 = vpop.f32.mrf.mxu1 }
  0xee   : > { %v2326_v25 = vpop.f32.mrf.mxu0  ;;  %v2786_v26 = vpop.f32.mrf.mxu1 }
  0xf0   : > { %v2788_v27 = vpop.f32.mrf.mxu0  ;;  %v2331_v28 = vpop.f32.mrf.mxu1 }
  0xf2   : > { %v2337_v29 = vpop.f32.mrf.mxu0  ;;  %v636_v30 = vpop.f32.mrf.mxu1 }
  0xf4   : > { %v705_v31 = vpop.f32.mrf.mxu0  ;;  %v2332_v32 = vpop.f32.mrf.mxu1 }
  0xf6   : > { %v2338_v33 = vpop.f32.mrf.mxu0  ;;  %v2790_v34 = vpop.f32.mrf.mxu1 }
  0xf7   : > { %v708_v33 = vadd.f32 %v2788_v27, %v2778_v62  ;;  %v762_v62 = vadd.f32 %v2790_v34, %v2780_v3 }
  0xf8   : > { %v817_v35 = vpop.f32.mrf.mxu0  ;;  %v2343_v37 = vpop.f32.mrf.mxu1 }
  0xf9   : > { %v2792_v36 = vadd.f32 %v817_v35, %v342_v4 }
  0xfa   : > { %v2349_v38 = vpop.f32.mrf.mxu0  ;;  %v759_v39 = vpop.f32.mrf.mxu1 }
  0xfc   : > { %v820_v40 = vpop.f32.mrf.mxu0  ;;  %v2344_v41 = vpop.f32.mrf.mxu1 }
  0xfd   : > { %v2809_v41 = vld [vmem:[%s2839_s2] ss:$0 sm:$0xff] }
  0xfe   : > { %v2350_v42 = vpop.f32.mrf.mxu0  ;;  %v2794_v43 = vpop.f32.mrf.mxu1 }
 0x100   : > { %v932_v44 = vpop.f32.mrf.mxu0  ;;  %v2355_v46 = vpop.f32.mrf.mxu1 }
 0x101   : > { %v2796_v45 = vadd.f32 %v932_v44, %v457_v1 }
 0x102   : > { %v2361_v47 = vpop.f32.mrf.mxu0  ;;  %v874_v48 = vpop.f32.mrf.mxu1 }
 0x104   : > { %v935_v49 = vpop.f32.mrf.mxu0  ;;  %v2356_v50 = vpop.f32.mrf.mxu1 }
 0x106   : > { %v2362_v51 = vpop.f32.mrf.mxu0  ;;  %v2798_v52 = vpop.f32.mrf.mxu1 }
 0x108   : > { %v1047_v53 = vpop.f32.mrf.mxu0  ;;  %v2367_v55 = vpop.f32.mrf.mxu1 }
 0x109   : > { %v2800_v54 = vadd.f32 %v1047_v53, %v572_v19 }
 0x10a   : > { %v2373_v56 = vpop.f32.mrf.mxu0  ;;  %v989_v57 = vpop.f32.mrf.mxu1 }
 0x10c   : > { %v1050_v58 = vpop.f32.mrf.mxu0  ;;  %v2368_v59 = vpop.f32.mrf.mxu1 }
 0x10e   : > { %v2374_v60 = vpop.f32.mrf.mxu0  ;;  %v2802_v61 = vpop.f32.mrf.mxu1 }
 0x110   : > { %v1163_v63 = vpop.f32.mrf.mxu0  ;;  %v2379_v0 = vpop.f32.mrf.mxu1 }
 0x111   : > { %v1169_v38 = vadd.f32 %v1163_v63, %v708_v33 }
 0x112   : > { %v2385_v2 = vpop.f32.mrf.mxu0  ;;  %v1097_v4 = vpop.f32.mrf.mxu1 }
 0x113   : > { %v877_v4 = vadd.f32 %v2794_v43, %v2782_v11  ;;  %v992_v11 = vadd.f32 %v2798_v52, %v2784_v18  ;;  %v1100_v52 = vadd.f32 %v2802_v61, %v2786_v26 }
 0x114   : > { %v1166_v5 = vpop.f32.mrf.mxu0  ;;  %v2380_v6 = vpop.f32.mrf.mxu1 }
 0x116   : > { %v2386_v7 = vpop.f32.mrf.mxu0  ;;  %v1217_v8 = vpop.f32.mrf.mxu1 }
 0x117   : > { %v1223_v51 = vadd.f32 %v1217_v8, %v762_v62 }
 0x118   : > { %v1278_v9 = vpop.f32.mrf.mxu0  ;;  %v2391_v10 = vpop.f32.mrf.mxu1 }
 0x119   : > { %v1284_v56 = vadd.f32 %v1278_v9, %v2792_v36 }
 0x11a   : > { %v2397_v1 = vpop.f32.mrf.mxu0  ;;  %v1220_v12 = vpop.f32.mrf.mxu1 }
 0x11c   : > { %v1281_v13 = vpop.f32.mrf.mxu0  ;;  %v2392_v14 = vpop.f32.mrf.mxu1 }
 0x11e   : > { %v2398_v15 = vpop.f32.mrf.mxu0  ;;  %v1332_v16 = vpop.f32.mrf.mxu1 }
 0x11f   : > { %v1338_v5 = vadd.f32 %v1332_v16, %v877_v4 }
 0x120   : > { %v1393_v17 = vpop.f32.mrf.mxu0  ;;  %v2403_v19 = vpop.f32.mrf.mxu1 }
 0x121   : > { %v1399_v36 = vadd.f32 %v1393_v17, %v2796_v45 }
 0x122   : > { %v2409_v20 = vpop.f32.mrf.mxu0  ;;  %v1335_v21 = vpop.f32.mrf.mxu1 }
 0x124   : > { %v1396_v22 = vpop.f32.mrf.mxu0  ;;  %v2404_v23 = vpop.f32.mrf.mxu1 }
 0x126   : > { %v2410_v24 = vpop.f32.mrf.mxu0  ;;  %v1447_v25 = vpop.f32.mrf.mxu1 }
 0x127   : > { %v1453_v19 = vadd.f32 %v1447_v25, %v992_v11 }
 0x128   : > { %v1508_v28 = vpop.f32.mrf.mxu0  ;;  %v2415_v29 = vpop.f32.mrf.mxu1 }
 0x129   : > { %v1514_v17 = vadd.f32 %v1508_v28, %v2800_v54 }
 0x12a   : > { %v2421_v30 = vpop.f32.mrf.mxu0  ;;  %v1450_v31 = vpop.f32.mrf.mxu1 }
 0x12c   : > { %v1511_v32 = vpop.f32.mrf.mxu0  ;;  %v2416_v35 = vpop.f32.mrf.mxu1 }
 0x12e   : > { %v2422_v37 = vpop.f32.mrf.mxu0  ;;  %v1555_v39 = vpop.f32.mrf.mxu1 }
 0x12f   : > { %v1561_v33 = vadd.f32 %v1555_v39, %v1100_v52 }
 0x130   : > { %v1618_v40 = vpop.f32.mrf.mxu0  ;;  %v2427_v44 = vpop.f32.mrf.mxu1 }
 0x131   : > { %v1624_v42 = vadd.f32 %v1618_v40, %v1169_v38 }
 0x132   : > { %v2433_v46 = vpop.f32.mrf.mxu0  ;;  %v1558_v48 = vpop.f32.mrf.mxu1 }
 0x133   : > { %v2039_v47 = vadd.f32 %v2809_v41, %v1624_v42 }
 0x134   : > { %v1621_v49 = vpop.f32.mrf.mxu0  ;;  %v2428_v27 = vpop.f32.mrf.mxu1 }
 0x135   : > { %2047 = vxpose.xlu0.b32.start [1/8] (short) (narrow) %v2039_v47, 32 }
 0x136   : > { %v2434_v50 = vpop.f32.mrf.mxu0  ;;  %v1679_v53 = vpop.f32.mrf.mxu1 }
 0x137   : > { %v1685_v57 = vadd.f32 %v1679_v53, %v1223_v51 }
 0x138   : > { %v1733_v55 = vpop.f32.mrf.mxu0  ;;  %v2439_v58 = vpop.f32.mrf.mxu1 }
 0x139   : > { %v1739_v60 = vadd.f32 %v1733_v55, %v1284_v56  ;;  %v2040_v63 = vadd.f32 %v2809_v41, %v1685_v57 }
 0x13a   : > { %v2445_v59 = vpop.f32.mrf.mxu0  ;;  %v1682_v0 = vpop.f32.mrf.mxu1 }
 0x13b   : > { %2048 = vxpose.xlu0.b32.cont [2/8] (short) (narrow) %v2040_v63, 32  ;;  %v2041_v6 = vadd.f32 %v2809_v41, %v1739_v60 }
 0x13c   : > { %v1736_v2 = vpop.f32.mrf.mxu0  ;;  %v2440_v3 = vpop.f32.mrf.mxu1 }
 0x13e   : > { %v2446_v34 = vpop.f32.mrf.mxu0  ;;  %v1794_v7 = vpop.f32.mrf.mxu1 }
 0x13f   : > { %v1800_v9 = vadd.f32 %v1794_v7, %v1338_v5  ;;  %2049 = vxpose.xlu0.b32.cont [3/8] (short) (narrow) %v2041_v6, 32 }
 0x140   : > { %v1848_v8 = vpop.f32.mrf.mxu0  ;;  %v2451_v10 = vpop.f32.mrf.mxu1 }
 0x141   : > { %v1854_v12 = vadd.f32 %v1848_v8, %v1399_v36  ;;  %v2042_v13 = vadd.f32 %v2809_v41, %v1800_v9 }
 0x142   : > { %v2457_v1 = vpop.f32.mrf.mxu0  ;;  %v1797_v14 = vpop.f32.mrf.mxu1 }
 0x143   : > { %2050 = vxpose.xlu0.b32.cont [4/8] (short) (narrow) %v2042_v13, 32  ;;  %v2043_v20 = vadd.f32 %v2809_v41, %v1854_v12 }
 0x144   : > { %v1851_v15 = vpop.f32.mrf.mxu0  ;;  %v2452_v43 = vpop.f32.mrf.mxu1 }
 0x146   : > { %v2458_v16 = vpop.f32.mrf.mxu0  ;;  %v1909_v21 = vpop.f32.mrf.mxu1 }
 0x147   : > { %v1915_v22 = vadd.f32 %v1909_v21, %v1453_v19  ;;  %2051 = vxpose.xlu0.b32.cont [5/8] (short) (narrow) %v2043_v20, 32 }
 0x148   : > { %v1956_v45 = vpop.f32.mrf.mxu0  ;;  %v2463_v23 = vpop.f32.mrf.mxu1 }
 0x149   : > { %v1962_v29 = vadd.f32 %v1956_v45, %v1514_v17  ;;  %v2044_v30 = vadd.f32 %v2809_v41, %v1915_v22 }
 0x14a   : > { %v2469_v24 = vpop.f32.mrf.mxu0  ;;  %v1912_v31 = vpop.f32.mrf.mxu1 }
 0x14b   : > { %2052 = vxpose.xlu0.b32.cont [6/8] (short) (narrow) %v2044_v30, 32  ;;  %v2045_v35 = vadd.f32 %v2809_v41, %v1962_v29 }
 0x14c   : > { %v1959_v18 = vpop.f32.mrf.mxu0  ;;  %v2464_v25 = vpop.f32.mrf.mxu1 }
 0x14e   : > { %v2470_v32 = vpop.f32.mrf.mxu0  ;;  %v2016_v54 = vpop.f32.mrf.mxu1 }
 0x14f   : > { %v2022_v28 = vadd.f32 %v2016_v54, %v1561_v33  ;;  %2053 = vxpose.xlu0.b32.cont [7/8] (short) (narrow) %v2045_v35, 32 }
 0x150   : > { %v2475_v37 = vpop.f32.mrf.mxu1 }
 0x151   : > { %v2046_v38 = vadd.f32 %v2809_v41, %v2022_v28 }
 0x152   : > { %v2019_v40 = vpop.f32.mrf.mxu1 }
 0x153   : > { %2054 = vxpose.xlu0.b32.end [8/8] (short) (narrow) %v2046_v38, 32 }
 0x154   : > { %v2476_v42 = vpop.f32.mrf.mxu1 }
 0x1b3   : > { %v2063_v26 = vpop.trf.xlu0 }
 0x1b4   : > { %2080 = vst.msk [vmem:[%s170_s4] sm:$0xff] %vm2079_vm2, %v2063_v26 }
 0x1b7   : > { %v2064_v61 = vpop.trf.xlu0 }
 0x1b8   : > { %2081 = vst.msk [vmem:[%s170_s4 + $0x8] sm:$0xff] %vm2079_vm2, %v2064_v61 }
 0x1bb   : > { %v2065_v39 = vpop.trf.xlu0 }
 0x1bc   : > { %2082 = vst.msk [vmem:[%s170_s4 + $0x10] sm:$0xff] %vm2079_vm2, %v2065_v39 }
 0x1bf   : > { %v2066_v44 = vpop.trf.xlu0 }
 0x1c0   : > { %2083 = vst.msk [vmem:[%s170_s4 + $0x18] sm:$0xff] %vm2079_vm2, %v2066_v44 }
 0x1c1 PF: > { %s13_s12 = sadd.s32 1, %s2526_s12  }
 0x1c2   : > { %p10_p4 = scmp.ge.s32.totalorder %s13_s12, 4  }
 0x1c4   :  { %12 = sbr.rel (!%p10_p4) target bundleno = 1 (0x1), region = 65 }

</bundles_post_ra>
